<compile_context>
chip_gen: v6e
topology: v6e:2x2x1
jax: 0.10.0
libtpu: 0.0.40
codegen_flags: <defaults>
</compile_context>

<pallas_src>
import jax
import jax.numpy as jnp
from jax import lax
from jax.experimental import pallas as pl
from jax.experimental.pallas import tpu as pltpu


def bilstm_kernel(x_ref, wx_ref, wh_ref, b_ref, wout_ref, bout_ref,
                  h0b_ref, c0b_ref, out_ref,
                  xproj_ref, hcat_ref, h_ref, c_ref):
    """One batch block: S timesteps x bt batch rows, both directions.

    Row layout of 2D slabs (x_ref, xproj_ref, hcat_ref, out_ref):
        row = t * bt + b     (t = timestep, b = batch row within block)
    State layout (h_ref, c_ref): rows [0:bt] forward chain, [bt:2bt] backward.
    Gate lane layout (4H wide): [ f | i | o | c_hat ], each H lanes.
    """
    SB = x_ref.shape[0]
    H = wh_ref.shape[0]
    bt = h_ref.shape[0] // 2
    S = SB // bt

    # ---- Phase 1: input projection for every timestep in ONE matmul -------
    xproj_ref[...] = (
        jnp.dot(x_ref[...], wx_ref[...], preferred_element_type=jnp.float32)
        + b_ref[...])

    # ---- State init (broadcasts hoisted, done once) ------------------------
    h_ref[0:bt, :] = jnp.zeros((bt, H), jnp.float32)
    c_ref[0:bt, :] = jnp.zeros((bt, H), jnp.float32)
    h_ref[bt:2 * bt, :] = jnp.broadcast_to(h0b_ref[...], (bt, H))
    c_ref[bt:2 * bt, :] = jnp.broadcast_to(c0b_ref[...], (bt, H))

    # ---- Phase 2: both time directions, ONE recurrent dot per step ---------
    def step(t):
        row_f = t * bt                 # forward-in-time rows
        row_b = (S - 1 - t) * bt       # backward-in-time rows
        if not isinstance(t, int):     # dynamic loop index: alignment hints
            row_f = pl.multiple_of(row_f, bt)
            row_b = pl.multiple_of(row_b, bt)

        # Stacked pre-activations; depends only on xproj (off the h-chain).
        xg = jnp.concatenate(
            [xproj_ref[pl.ds(row_f, bt), :], xproj_ref[pl.ds(row_b, bt), :]],
            axis=0)
        # Single (2*bt, H) @ (H, 4H) matmul feeds both directions.
        g = xg + jnp.dot(h_ref[...], wh_ref[...],
                         preferred_element_type=jnp.float32)

        sg = jax.nn.sigmoid(g[:, 0:3 * H])     # one EUP pass over f|i|o lanes
        f_t = sg[:, 0:H]
        i_t = sg[:, H:2 * H]
        o_t = sg[:, 2 * H:3 * H]
        c_hat = jnp.tanh(g[:, 3 * H:4 * H])

        c_new = f_t * c_ref[...] + i_t * c_hat
        h_new = o_t * jnp.tanh(c_new)
        c_ref[...] = c_new
        h_ref[...] = h_new

        # Stash hidden states lane-concatenated per *actual* timestep.
        hcat_ref[pl.ds(row_f, bt), 0:H] = h_new[0:bt, :]
        hcat_ref[pl.ds(row_b, bt), H:2 * H] = h_new[bt:2 * bt, :]

    if S <= 32 and bt <= 32:
        # Full unroll: static indices + cross-iteration scheduler visibility.
        for t in range(S):
            step(t)
    else:
        def body(t, carry):
            step(t)
            return carry
        lax.fori_loop(0, S, body, 0, unroll=4)

    # ---- Phase 3: output projection in ONE matmul, single lane-dense store -
    out_ref[...] = (
        jnp.dot(hcat_ref[...], wout_ref[...],
                preferred_element_type=jnp.float32)
        + bout_ref[...])


# ----------------------------- wrapper --------------------------------------
def _round_up(a, b):
    return -(-a // b) * b


def _vmem_capacity_bytes():
    try:
        return int(pltpu.get_tpu_info().vmem_capacity_bytes)
    except Exception:
        return 64 * 1024 * 1024        # conservative (v7x per-TC) fallback


def _choose_batch_tile(B, S, I, H, O, cap):
    f32 = 4
    # resident bytes per (t, b) row: x (x2 buffers) + xproj + hcat + out (x2)
    per_row = f32 * (2 * I + 4 * H + 2 * H + 2 * O)
    budget = cap // 2                  # stay well under the hard VMEM cap
    bt = _round_up(min(max(B, 1), 128), 8)
    if B >= 16:                        # keep >=2 grid blocks (2 TCs / megacore)
        half = _round_up(_round_up(B, 8) // 2, 8)
        bt = min(bt, max(half, 8))
    while bt > 8 and S * bt * per_row > budget:
        bt -= 8
    Bpad = _round_up(B, bt)
    return bt, Bpad


def _vmem_limit_bytes(S, bt, I, H, O, cap):
    f32 = 4
    blocks = (S * bt * I + S * bt * O) * f32 * 2          # in/out double-buffered
    weights = (I * 4 * H + H * 4 * H + 4 * H
               + 2 * H * O + O + 2 * H) * f32 * 2
    scratch = (S * bt * 4 * H + S * bt * 2 * H + 4 * bt * H) * f32
    need = int((blocks + weights + scratch) * 1.5)        # headroom
    hi = int(cap * 0.85)               # leave compiler headroom (gen-aware)
    return min(max(need, 32 * 1024 * 1024), hi)


def bilstm_forward(x, p):
    """x: (B, S, I) float32  ->  (B, S, O) float32."""
    B, S, I = x.shape
    H = p["wh"].shape[0]
    O = p["wout"].shape[-1]

    cap = _vmem_capacity_bytes()
    bt, Bpad = _choose_batch_tile(B, S, I, H, O, cap)
    nb = Bpad // bt

    # Layout plumbing (XLA side): (B,S,I) -> batch-block-major 2D slab with
    # row = block*S*bt + t*bt + b  (each grid step sees one contiguous block).
    xp = jnp.pad(x, ((0, Bpad - B), (0, 0), (0, 0)))
    x2d = (xp.reshape(nb, bt, S, I)
             .transpose(0, 2, 1, 3)
             .reshape(nb * S * bt, I))

    out2d = pl.pallas_call(
        bilstm_kernel,
        out_shape=jax.ShapeDtypeStruct((nb * S * bt, O), jnp.float32),
        grid=(nb,),
        in_specs=[
            pl.BlockSpec((S * bt, I), lambda g: (g, 0)),     # x block (batch-tiled)
            pl.BlockSpec((I, 4 * H), lambda g: (0, 0)),      # wx (resident)
            pl.BlockSpec((H, 4 * H), lambda g: (0, 0)),      # wh
            pl.BlockSpec((1, 4 * H), lambda g: (0, 0)),      # gate bias
            pl.BlockSpec((2 * H, O), lambda g: (0, 0)),      # wout [fwd; bwd]
            pl.BlockSpec((1, O), lambda g: (0, 0)),          # bout
            pl.BlockSpec((1, H), lambda g: (0, 0)),          # backward h0
            pl.BlockSpec((1, H), lambda g: (0, 0)),          # backward c0
        ],
        out_specs=pl.BlockSpec((S * bt, O), lambda g: (g, 0)),
        scratch_shapes=[
            pltpu.VMEM((S * bt, 4 * H), jnp.float32),   # hoisted input projection
            pltpu.VMEM((S * bt, 2 * H), jnp.float32),   # [fwd | bwd] hidden seq
            pltpu.VMEM((2 * bt, H), jnp.float32),       # stacked h state
            pltpu.VMEM((2 * bt, H), jnp.float32),       # stacked c state
        ],
        compiler_params=pltpu.CompilerParams(
            dimension_semantics=("parallel",),
            vmem_limit_bytes=_vmem_limit_bytes(S, bt, I, H, O, cap),
        ),
    )(x2d, p["wx"], p["wh"], p["b"], p["wout"], p["bout"], p["h0"], p["c0"])

    out = (out2d.reshape(nb, S, bt, O)
                .transpose(0, 2, 1, 3)
                .reshape(Bpad, S, O))
    return out[:B]


# --------------------------- params & reference ------------------------------
def init_params(key, input_size, hidden_size, output_size):
    ks = jax.random.split(key, 12)
    I, H, O = input_size, hidden_size, output_size
    # gate order (f, i, o, c); each gate is Linear(I+H, H) -> split x/h parts
    gate_w = [jax.random.normal(ks[g], (I + H, H), jnp.float32) * 0.1
              for g in range(4)]
    gate_b = [jax.random.normal(ks[4 + g], (1, H), jnp.float32) * 0.1
              for g in range(4)]
    wx = jnp.concatenate([w[:I] for w in gate_w], axis=1)    # (I, 4H)
    wh = jnp.concatenate([w[I:] for w in gate_w], axis=1)    # (H, 4H)
    b = jnp.concatenate(gate_b, axis=1)                      # (1, 4H)
    wout = jax.random.normal(ks[8], (2 * H, O), jnp.float32) * 0.1
    bout = jax.random.normal(ks[9], (1, O), jnp.float32) * 0.1
    h0 = jax.random.normal(ks[10], (1, H), jnp.float32)
    c0 = jax.random.normal(ks[11], (1, H), jnp.float32)
    return {"wx": wx, "wh": wh, "b": b, "wout": wout, "bout": bout,
            "h0": h0, "c0": c0}


def bilstm_ref(x, p):
    """Pure-JAX reference mirroring the PyTorch forward exactly."""
    B, S, _ = x.shape
    H = p["wh"].shape[0]

    def gates(x_t, h):
        g = x_t @ p["wx"] + h @ p["wh"] + p["b"]
        return (jax.nn.sigmoid(g[:, :H]), jax.nn.sigmoid(g[:, H:2 * H]),
                jax.nn.sigmoid(g[:, 2 * H:3 * H]), jnp.tanh(g[:, 3 * H:]))

    h = jnp.zeros((B, H), jnp.float32)
    c = jnp.zeros((B, H), jnp.float32)
    fwd = []
    for t in range(S):
        f, i, o, chat = gates(x[:, t, :], h)
        c = f * c + i * chat
        h = o * jnp.tanh(c)
        fwd.append(h)

    hb = jnp.broadcast_to(p["h0"], (B, H))
    cb = jnp.broadcast_to(p["c0"], (B, H))
    bwd = [None] * S
    for t in reversed(range(S)):
        f, i, o, chat = gates(x[:, t, :], hb)
        cb = f * cb + i * chat
        hb = o * jnp.tanh(cb)
        bwd[t] = hb

    outs = [jnp.concatenate([fwd[t], bwd[t]], axis=1) @ p["wout"] + p["bout"]
            for t in range(S)]
    return jnp.stack(outs, axis=1)


if __name__ == "__main__":
    batch, seq_len = 2, 8
    input_size, hidden_size, output_size = 16, 32, 8

    key = jax.random.PRNGKey(0)
    k_x, k_p = jax.random.split(key)
    x = jax.random.normal(k_x, (batch, seq_len, input_size), jnp.float32)
    params = init_params(k_p, input_size, hidden_size, output_size)

    out = jax.block_until_ready(bilstm_forward(x, params))
    ref = jax.block_until_ready(bilstm_ref(x, params))

    assert out.shape == (batch, seq_len, output_size)
    assert jnp.allclose(out, ref, rtol=1e-3, atol=1e-3)
    print("KERNEL_OK")
</pallas_src>

<mosaic_0001>
module attributes {stable_mosaic.version = 11 : i64} {
  func.func @bilstm_kernel(%arg0: i32, %arg1: memref<64x16xf32, #tpu.memory_space<vmem>>, %arg2: memref<16x128xf32, #tpu.memory_space<vmem>>, %arg3: memref<32x128xf32, #tpu.memory_space<vmem>>, %arg4: memref<1x128xf32, #tpu.memory_space<vmem>>, %arg5: memref<64x8xf32, #tpu.memory_space<vmem>>, %arg6: memref<1x8xf32, #tpu.memory_space<vmem>>, %arg7: memref<1x32xf32, #tpu.memory_space<vmem>>, %arg8: memref<1x32xf32, #tpu.memory_space<vmem>>, %arg9: memref<64x8xf32, #tpu.memory_space<vmem>>, %arg10: memref<64x128xf32, #tpu.memory_space<vmem>>, %arg11: memref<64x64xf32, #tpu.memory_space<vmem>>, %arg12: memref<16x32xf32, #tpu.memory_space<vmem>>, %arg13: memref<16x32xf32, #tpu.memory_space<vmem>>) attributes {dimension_semantics = [#tpu.dimension_semantics<parallel>], iteration_bounds = array<i64: 1>, scalar_prefetch = 0 : i64, scratch_operands = 4 : i64, tpu.core_type = #tpu.core_type<tc>, window_params = [{transform_indices = @transform_0, window_bounds = array<i64: 64, 16>}, {pipeline_mode = #tpu.pipeline_mode<synchronous>, transform_indices = @transform_1, window_bounds = array<i64: 16, 128>}, {pipeline_mode = #tpu.pipeline_mode<synchronous>, transform_indices = @transform_2, window_bounds = array<i64: 32, 128>}, {pipeline_mode = #tpu.pipeline_mode<synchronous>, transform_indices = @transform_3, window_bounds = array<i64: 1, 128>}, {pipeline_mode = #tpu.pipeline_mode<synchronous>, transform_indices = @transform_4, window_bounds = array<i64: 64, 8>}, {pipeline_mode = #tpu.pipeline_mode<synchronous>, transform_indices = @transform_5, window_bounds = array<i64: 1, 8>}, {pipeline_mode = #tpu.pipeline_mode<synchronous>, transform_indices = @transform_6, window_bounds = array<i64: 1, 32>}, {pipeline_mode = #tpu.pipeline_mode<synchronous>, transform_indices = @transform_7, window_bounds = array<i64: 1, 32>}, {transform_indices = @transform_8, window_bounds = array<i64: 64, 8>}]} {
    %c0 = arith.constant 0 : index
    %c0_0 = arith.constant 0 : index
    %0 = vector.load %arg1[%c0, %c0_0] : memref<64x16xf32, #tpu.memory_space<vmem>>, vector<64x16xf32>
    %c0_1 = arith.constant 0 : index
    %c0_2 = arith.constant 0 : index
    %1 = vector.load %arg2[%c0_1, %c0_2] : memref<16x128xf32, #tpu.memory_space<vmem>>, vector<16x128xf32>
    %cst = arith.constant dense<0.000000e+00> : vector<64x128xf32>
    %2 = tpu.matmul %0, %1, %cst {dimension_numbers = #tpu.dot_dimension_numbers<[1], [0], [0], [1], [0, 0, 1, 1], [], []>} : vector<64x16xf32>, vector<16x128xf32>, vector<64x128xf32> -> vector<64x128xf32>
    %c0_3 = arith.constant 0 : index
    %c0_4 = arith.constant 0 : index
    %3 = vector.load %arg4[%c0_3, %c0_4] : memref<1x128xf32, #tpu.memory_space<vmem>>, vector<1x128xf32>
    %4 = vector.broadcast %3 : vector<1x128xf32> to vector<64x128xf32>
    %5 = arith.addf %2, %4 : vector<64x128xf32>
    %c0_5 = arith.constant 0 : index
    %c0_6 = arith.constant 0 : index
    %6 = vector.load %arg10[%c0_5, %c0_6] : memref<64x128xf32, #tpu.memory_space<vmem>>, vector<64x128xf32>
    tpu.vector_store %arg10[%c0_5, %c0_6], %5 {strides = array<i32>} : memref<64x128xf32, #tpu.memory_space<vmem>>, vector<64x128xf32>,
    %cst_7 = arith.constant 0.000000e+00 : f32
    %7 = vector.broadcast %cst_7 : f32 to vector<8x32xf32>
    %c0_8 = arith.constant 0 : index
    %c0_9 = arith.constant 0 : index
    %8 = vector.load %arg12[%c0_8, %c0_9] : memref<16x32xf32, #tpu.memory_space<vmem>>, vector<8x32xf32>
    tpu.vector_store %arg12[%c0_8, %c0_9], %7 {strides = array<i32>} : memref<16x32xf32, #tpu.memory_space<vmem>>, vector<8x32xf32>,
    %cst_10 = arith.constant 0.000000e+00 : f32
    %9 = vector.broadcast %cst_10 : f32 to vector<8x32xf32>
    %c0_11 = arith.constant 0 : index
    %c0_12 = arith.constant 0 : index
    %10 = vector.load %arg13[%c0_11, %c0_12] : memref<16x32xf32, #tpu.memory_space<vmem>>, vector<8x32xf32>
    tpu.vector_store %arg13[%c0_11, %c0_12], %9 {strides = array<i32>} : memref<16x32xf32, #tpu.memory_space<vmem>>, vector<8x32xf32>,
    %c0_13 = arith.constant 0 : index
    %c0_14 = arith.constant 0 : index
    %11 = vector.load %arg7[%c0_13, %c0_14] : memref<1x32xf32, #tpu.memory_space<vmem>>, vector<1x32xf32>
    %12 = vector.shape_cast %11 : vector<1x32xf32> to vector<1x32xf32>
    %13 = vector.broadcast %12 : vector<1x32xf32> to vector<8x32xf32>
    %c8 = arith.constant 8 : index
    %c0_15 = arith.constant 0 : index
    %14 = vector.load %arg12[%c8, %c0_15] : memref<16x32xf32, #tpu.memory_space<vmem>>, vector<8x32xf32>
    tpu.vector_store %arg12[%c8, %c0_15], %13 {strides = array<i32>} : memref<16x32xf32, #tpu.memory_space<vmem>>, vector<8x32xf32>,
    %c0_16 = arith.constant 0 : index
    %c0_17 = arith.constant 0 : index
    %15 = vector.load %arg8[%c0_16, %c0_17] : memref<1x32xf32, #tpu.memory_space<vmem>>, vector<1x32xf32>
    %16 = vector.shape_cast %15 : vector<1x32xf32> to vector<1x32xf32>
    %17 = vector.broadcast %16 : vector<1x32xf32> to vector<8x32xf32>
    %c8_18 = arith.constant 8 : index
    %c0_19 = arith.constant 0 : index
    %18 = vector.load %arg13[%c8_18, %c0_19] : memref<16x32xf32, #tpu.memory_space<vmem>>, vector<8x32xf32>
    tpu.vector_store %arg13[%c8_18, %c0_19], %17 {strides = array<i32>} : memref<16x32xf32, #tpu.memory_space<vmem>>, vector<8x32xf32>,
    %c0_20 = arith.constant 0 : index
    %c0_21 = arith.constant 0 : index
    %19 = vector.load %arg10[%c0_20, %c0_21] : memref<64x128xf32, #tpu.memory_space<vmem>>, vector<8x128xf32>
    %c56 = arith.constant 56 : index
    %c0_22 = arith.constant 0 : index
    %20 = vector.load %arg10[%c56, %c0_22] : memref<64x128xf32, #tpu.memory_space<vmem>>, vector<8x128xf32>
    %21 = tpu.concatenate %19, %20 in 0 : vector<8x128xf32>, vector<8x128xf32> -> vector<16x128xf32>
    %c0_23 = arith.constant 0 : index
    %c0_24 = arith.constant 0 : index
    %22 = vector.load %arg12[%c0_23, %c0_24] : memref<16x32xf32, #tpu.memory_space<vmem>>, vector<16x32xf32>
    %c0_25 = arith.constant 0 : index
    %c0_26 = arith.constant 0 : index
    %23 = vector.load %arg3[%c0_25, %c0_26] : memref<32x128xf32, #tpu.memory_space<vmem>>, vector<32x128xf32>
    %cst_27 = arith.constant dense<0.000000e+00> : vector<16x128xf32>
    %24 = tpu.matmul %22, %23, %cst_27 {dimension_numbers = #tpu.dot_dimension_numbers<[1], [0], [0], [1], [0, 0, 1, 1], [], []>} : vector<16x32xf32>, vector<32x128xf32>, vector<16x128xf32> -> vector<16x128xf32>
    %25 = arith.addf %21, %24 : vector<16x128xf32>
    %26 = vector.extract_strided_slice %25 {offsets = [0, 0], sizes = [16, 96], strides = [1, 1]} : vector<16x128xf32> to vector<16x96xf32>
    %27 = arith.negf %26 : vector<16x96xf32>
    %28 = math.exp %27 : vector<16x96xf32>
    %cst_28 = arith.constant 1.000000e+00 : f32
    %29 = vector.broadcast %cst_28 : f32 to vector<16x96xf32>
    %30 = arith.addf %29, %28 : vector<16x96xf32>
    %31 = arith.divf %29, %30 : vector<16x96xf32>
    %32 = vector.extract_strided_slice %31 {offsets = [0, 0], sizes = [16, 32], strides = [1, 1]} : vector<16x96xf32> to vector<16x32xf32>
    %33 = vector.extract_strided_slice %31 {offsets = [0, 32], sizes = [16, 32], strides = [1, 1]} : vector<16x96xf32> to vector<16x32xf32>
    %34 = vector.extract_strided_slice %31 {offsets = [0, 64], sizes = [16, 32], strides = [1, 1]} : vector<16x96xf32> to vector<16x32xf32>
    %35 = vector.extract_strided_slice %25 {offsets = [0, 96], sizes = [16, 32], strides = [1, 1]} : vector<16x128xf32> to vector<16x32xf32>
    %36 = math.tanh %35 : vector<16x32xf32>
    %c0_29 = arith.constant 0 : index
    %c0_30 = arith.constant 0 : index
    %37 = vector.load %arg13[%c0_29, %c0_30] : memref<16x32xf32, #tpu.memory_space<vmem>>, vector<16x32xf32>
    %38 = arith.mulf %32, %37 : vector<16x32xf32>
    %39 = arith.mulf %33, %36 : vector<16x32xf32>
    %40 = arith.addf %38, %39 : vector<16x32xf32>
    %41 = math.tanh %40 : vector<16x32xf32>
    %42 = arith.mulf %34, %41 : vector<16x32xf32>
    %c0_31 = arith.constant 0 : index
    %c0_32 = arith.constant 0 : index
    %43 = vector.load %arg13[%c0_31, %c0_32] : memref<16x32xf32, #tpu.memory_space<vmem>>, vector<16x32xf32>
    tpu.vector_store %arg13[%c0_31, %c0_32], %40 {strides = array<i32>} : memref<16x32xf32, #tpu.memory_space<vmem>>, vector<16x32xf32>,
    %c0_33 = arith.constant 0 : index
    %c0_34 = arith.constant 0 : index
    %44 = vector.load %arg12[%c0_33, %c0_34] : memref<16x32xf32, #tpu.memory_space<vmem>>, vector<16x32xf32>
    tpu.vector_store %arg12[%c0_33, %c0_34], %42 {strides = array<i32>} : memref<16x32xf32, #tpu.memory_space<vmem>>, vector<16x32xf32>,
    %45 = vector.extract_strided_slice %42 {offsets = [0, 0], sizes = [8, 32], strides = [1, 1]} : vector<16x32xf32> to vector<8x32xf32>
    %c0_35 = arith.constant 0 : index
    %c0_36 = arith.constant 0 : index
    %46 = vector.load %arg11[%c0_35, %c0_36] : memref<64x64xf32, #tpu.memory_space<vmem>>, vector<8x32xf32>
    tpu.vector_store %arg11[%c0_35, %c0_36], %45 {strides = array<i32>} : memref<64x64xf32, #tpu.memory_space<vmem>>, vector<8x32xf32>,
    %47 = vector.extract_strided_slice %42 {offsets = [8, 0], sizes = [8, 32], strides = [1, 1]} : vector<16x32xf32> to vector<8x32xf32>
    %c56_37 = arith.constant 56 : index
    %c32 = arith.constant 32 : index
    %48 = vector.load %arg11[%c56_37, %c32] : memref<64x64xf32, #tpu.memory_space<vmem>>, vector<8x32xf32>
    tpu.vector_store %arg11[%c56_37, %c32], %47 {strides = array<i32>} : memref<64x64xf32, #tpu.memory_space<vmem>>, vector<8x32xf32>,
    %c8_38 = arith.constant 8 : index
    %c0_39 = arith.constant 0 : index
    %49 = vector.load %arg10[%c8_38, %c0_39] : memref<64x128xf32, #tpu.memory_space<vmem>>, vector<8x128xf32>
    %c48 = arith.constant 48 : index
    %c0_40 = arith.constant 0 : index
    %50 = vector.load %arg10[%c48, %c0_40] : memref<64x128xf32, #tpu.memory_space<vmem>>, vector<8x128xf32>
    %51 = tpu.concatenate %49, %50 in 0 : vector<8x128xf32>, vector<8x128xf32> -> vector<16x128xf32>
    %c0_41 = arith.constant 0 : index
    %c0_42 = arith.constant 0 : index
    %52 = vector.load %arg12[%c0_41, %c0_42] : memref<16x32xf32, #tpu.memory_space<vmem>>, vector<16x32xf32>
    %c0_43 = arith.constant 0 : index
    %c0_44 = arith.constant 0 : index
    %53 = vector.load %arg3[%c0_43, %c0_44] : memref<32x128xf32, #tpu.memory_space<vmem>>, vector<32x128xf32>
    %cst_45 = arith.constant dense<0.000000e+00> : vector<16x128xf32>
    %54 = tpu.matmul %52, %53, %cst_45 {dimension_numbers = #tpu.dot_dimension_numbers<[1], [0], [0], [1], [0, 0, 1, 1], [], []>} : vector<16x32xf32>, vector<32x128xf32>, vector<16x128xf32> -> vector<16x128xf32>
    %55 = arith.addf %51, %54 : vector<16x128xf32>
    %56 = vector.extract_strided_slice %55 {offsets = [0, 0], sizes = [16, 96], strides = [1, 1]} : vector<16x128xf32> to vector<16x96xf32>
    %57 = arith.negf %56 : vector<16x96xf32>
    %58 = math.exp %57 : vector<16x96xf32>
    %cst_46 = arith.constant 1.000000e+00 : f32
    %59 = vector.broadcast %cst_46 : f32 to vector<16x96xf32>
    %60 = arith.addf %59, %58 : vector<16x96xf32>
    %61 = arith.divf %59, %60 : vector<16x96xf32>
    %62 = vector.extract_strided_slice %61 {offsets = [0, 0], sizes = [16, 32], strides = [1, 1]} : vector<16x96xf32> to vector<16x32xf32>
    %63 = vector.extract_strided_slice %61 {offsets = [0, 32], sizes = [16, 32], strides = [1, 1]} : vector<16x96xf32> to vector<16x32xf32>
    %64 = vector.extract_strided_slice %61 {offsets = [0, 64], sizes = [16, 32], strides = [1, 1]} : vector<16x96xf32> to vector<16x32xf32>
    %65 = vector.extract_strided_slice %55 {offsets = [0, 96], sizes = [16, 32], strides = [1, 1]} : vector<16x128xf32> to vector<16x32xf32>
    %66 = math.tanh %65 : vector<16x32xf32>
    %c0_47 = arith.constant 0 : index
    %c0_48 = arith.constant 0 : index
    %67 = vector.load %arg13[%c0_47, %c0_48] : memref<16x32xf32, #tpu.memory_space<vmem>>, vector<16x32xf32>
    %68 = arith.mulf %62, %67 : vector<16x32xf32>
    %69 = arith.mulf %63, %66 : vector<16x32xf32>
    %70 = arith.addf %68, %69 : vector<16x32xf32>
    %71 = math.tanh %70 : vector<16x32xf32>
    %72 = arith.mulf %64, %71 : vector<16x32xf32>
    %c0_49 = arith.constant 0 : index
    %c0_50 = arith.constant 0 : index
    %73 = vector.load %arg13[%c0_49, %c0_50] : memref<16x32xf32, #tpu.memory_space<vmem>>, vector<16x32xf32>
    tpu.vector_store %arg13[%c0_49, %c0_50], %70 {strides = array<i32>} : memref<16x32xf32, #tpu.memory_space<vmem>>, vector<16x32xf32>,
    %c0_51 = arith.constant 0 : index
    %c0_52 = arith.constant 0 : index
    %74 = vector.load %arg12[%c0_51, %c0_52] : memref<16x32xf32, #tpu.memory_space<vmem>>, vector<16x32xf32>
    tpu.vector_store %arg12[%c0_51, %c0_52], %72 {strides = array<i32>} : memref<16x32xf32, #tpu.memory_space<vmem>>, vector<16x32xf32>,
    %75 = vector.extract_strided_slice %72 {offsets = [0, 0], sizes = [8, 32], strides = [1, 1]} : vector<16x32xf32> to vector<8x32xf32>
    %c8_53 = arith.constant 8 : index
    %c0_54 = arith.constant 0 : index
    %76 = vector.load %arg11[%c8_53, %c0_54] : memref<64x64xf32, #tpu.memory_space<vmem>>, vector<8x32xf32>
    tpu.vector_store %arg11[%c8_53, %c0_54], %75 {strides = array<i32>} : memref<64x64xf32, #tpu.memory_space<vmem>>, vector<8x32xf32>,
    %77 = vector.extract_strided_slice %72 {offsets = [8, 0], sizes = [8, 32], strides = [1, 1]} : vector<16x32xf32> to vector<8x32xf32>
    %c48_55 = arith.constant 48 : index
    %c32_56 = arith.constant 32 : index
    %78 = vector.load %arg11[%c48_55, %c32_56] : memref<64x64xf32, #tpu.memory_space<vmem>>, vector<8x32xf32>
    tpu.vector_store %arg11[%c48_55, %c32_56], %77 {strides = array<i32>} : memref<64x64xf32, #tpu.memory_space<vmem>>, vector<8x32xf32>,
    %c16 = arith.constant 16 : index
    %c0_57 = arith.constant 0 : index
    %79 = vector.load %arg10[%c16, %c0_57] : memref<64x128xf32, #tpu.memory_space<vmem>>, vector<8x128xf32>
    %c40 = arith.constant 40 : index
    %c0_58 = arith.constant 0 : index
    %80 = vector.load %arg10[%c40, %c0_58] : memref<64x128xf32, #tpu.memory_space<vmem>>, vector<8x128xf32>
    %81 = tpu.concatenate %79, %80 in 0 : vector<8x128xf32>, vector<8x128xf32> -> vector<16x128xf32>
    %c0_59 = arith.constant 0 : index
    %c0_60 = arith.constant 0 : index
    %82 = vector.load %arg12[%c0_59, %c0_60] : memref<16x32xf32, #tpu.memory_space<vmem>>, vector<16x32xf32>
    %c0_61 = arith.constant 0 : index
    %c0_62 = arith.constant 0 : index
    %83 = vector.load %arg3[%c0_61, %c0_62] : memref<32x128xf32, #tpu.memory_space<vmem>>, vector<32x128xf32>
    %cst_63 = arith.constant dense<0.000000e+00> : vector<16x128xf32>
    %84 = tpu.matmul %82, %83, %cst_63 {dimension_numbers = #tpu.dot_dimension_numbers<[1], [0], [0], [1], [0, 0, 1, 1], [], []>} : vector<16x32xf32>, vector<32x128xf32>, vector<16x128xf32> -> vector<16x128xf32>
    %85 = arith.addf %81, %84 : vector<16x128xf32>
    %86 = vector.extract_strided_slice %85 {offsets = [0, 0], sizes = [16, 96], strides = [1, 1]} : vector<16x128xf32> to vector<16x96xf32>
    %87 = arith.negf %86 : vector<16x96xf32>
    %88 = math.exp %87 : vector<16x96xf32>
    %cst_64 = arith.constant 1.000000e+00 : f32
    %89 = vector.broadcast %cst_64 : f32 to vector<16x96xf32>
    %90 = arith.addf %89, %88 : vector<16x96xf32>
    %91 = arith.divf %89, %90 : vector<16x96xf32>
    %92 = vector.extract_strided_slice %91 {offsets = [0, 0], sizes = [16, 32], strides = [1, 1]} : vector<16x96xf32> to vector<16x32xf32>
    %93 = vector.extract_strided_slice %91 {offsets = [0, 32], sizes = [16, 32], strides = [1, 1]} : vector<16x96xf32> to vector<16x32xf32>
    %94 = vector.extract_strided_slice %91 {offsets = [0, 64], sizes = [16, 32], strides = [1, 1]} : vector<16x96xf32> to vector<16x32xf32>
    %95 = vector.extract_strided_slice %85 {offsets = [0, 96], sizes = [16, 32], strides = [1, 1]} : vector<16x128xf32> to vector<16x32xf32>
    %96 = math.tanh %95 : vector<16x32xf32>
    %c0_65 = arith.constant 0 : index
    %c0_66 = arith.constant 0 : index
    %97 = vector.load %arg13[%c0_65, %c0_66] : memref<16x32xf32, #tpu.memory_space<vmem>>, vector<16x32xf32>
    %98 = arith.mulf %92, %97 : vector<16x32xf32>
    %99 = arith.mulf %93, %96 : vector<16x32xf32>
    %100 = arith.addf %98, %99 : vector<16x32xf32>
    %101 = math.tanh %100 : vector<16x32xf32>
    %102 = arith.mulf %94, %101 : vector<16x32xf32>
    %c0_67 = arith.constant 0 : index
    %c0_68 = arith.constant 0 : index
    %103 = vector.load %arg13[%c0_67, %c0_68] : memref<16x32xf32, #tpu.memory_space<vmem>>, vector<16x32xf32>
    tpu.vector_store %arg13[%c0_67, %c0_68], %100 {strides = array<i32>} : memref<16x32xf32, #tpu.memory_space<vmem>>, vector<16x32xf32>,
    %c0_69 = arith.constant 0 : index
    %c0_70 = arith.constant 0 : index
    %104 = vector.load %arg12[%c0_69, %c0_70] : memref<16x32xf32, #tpu.memory_space<vmem>>, vector<16x32xf32>
    tpu.vector_store %arg12[%c0_69, %c0_70], %102 {strides = array<i32>} : memref<16x32xf32, #tpu.memory_space<vmem>>, vector<16x32xf32>,
    %105 = vector.extract_strided_slice %102 {offsets = [0, 0], sizes = [8, 32], strides = [1, 1]} : vector<16x32xf32> to vector<8x32xf32>
    %c16_71 = arith.constant 16 : index
    %c0_72 = arith.constant 0 : index
    %106 = vector.load %arg11[%c16_71, %c0_72] : memref<64x64xf32, #tpu.memory_space<vmem>>, vector<8x32xf32>
    tpu.vector_store %arg11[%c16_71, %c0_72], %105 {strides = array<i32>} : memref<64x64xf32, #tpu.memory_space<vmem>>, vector<8x32xf32>,
    %107 = vector.extract_strided_slice %102 {offsets = [8, 0], sizes = [8, 32], strides = [1, 1]} : vector<16x32xf32> to vector<8x32xf32>
    %c40_73 = arith.constant 40 : index
    %c32_74 = arith.constant 32 : index
    %108 = vector.load %arg11[%c40_73, %c32_74] : memref<64x64xf32, #tpu.memory_space<vmem>>, vector<8x32xf32>
    tpu.vector_store %arg11[%c40_73, %c32_74], %107 {strides = array<i32>} : memref<64x64xf32, #tpu.memory_space<vmem>>, vector<8x32xf32>,
    %c24 = arith.constant 24 : index
    %c0_75 = arith.constant 0 : index
    %109 = vector.load %arg10[%c24, %c0_75] : memref<64x128xf32, #tpu.memory_space<vmem>>, vector<8x128xf32>
    %c32_76 = arith.constant 32 : index
    %c0_77 = arith.constant 0 : index
    %110 = vector.load %arg10[%c32_76, %c0_77] : memref<64x128xf32, #tpu.memory_space<vmem>>, vector<8x128xf32>
    %111 = tpu.concatenate %109, %110 in 0 : vector<8x128xf32>, vector<8x128xf32> -> vector<16x128xf32>
    %c0_78 = arith.constant 0 : index
    %c0_79 = arith.constant 0 : index
    %112 = vector.load %arg12[%c0_78, %c0_79] : memref<16x32xf32, #tpu.memory_space<vmem>>, vector<16x32xf32>
    %c0_80 = arith.constant 0 : index
    %c0_81 = arith.constant 0 : index
    %113 = vector.load %arg3[%c0_80, %c0_81] : memref<32x128xf32, #tpu.memory_space<vmem>>, vector<32x128xf32>
    %cst_82 = arith.constant dense<0.000000e+00> : vector<16x128xf32>
    %114 = tpu.matmul %112, %113, %cst_82 {dimension_numbers = #tpu.dot_dimension_numbers<[1], [0], [0], [1], [0, 0, 1, 1], [], []>} : vector<16x32xf32>, vector<32x128xf32>, vector<16x128xf32> -> vector<16x128xf32>
    %115 = arith.addf %111, %114 : vector<16x128xf32>
    %116 = vector.extract_strided_slice %115 {offsets = [0, 0], sizes = [16, 96], strides = [1, 1]} : vector<16x128xf32> to vector<16x96xf32>
    %117 = arith.negf %116 : vector<16x96xf32>
    %118 = math.exp %117 : vector<16x96xf32>
    %cst_83 = arith.constant 1.000000e+00 : f32
    %119 = vector.broadcast %cst_83 : f32 to vector<16x96xf32>
    %120 = arith.addf %119, %118 : vector<16x96xf32>
    %121 = arith.divf %119, %120 : vector<16x96xf32>
    %122 = vector.extract_strided_slice %121 {offsets = [0, 0], sizes = [16, 32], strides = [1, 1]} : vector<16x96xf32> to vector<16x32xf32>
    %123 = vector.extract_strided_slice %121 {offsets = [0, 32], sizes = [16, 32], strides = [1, 1]} : vector<16x96xf32> to vector<16x32xf32>
    %124 = vector.extract_strided_slice %121 {offsets = [0, 64], sizes = [16, 32], strides = [1, 1]} : vector<16x96xf32> to vector<16x32xf32>
    %125 = vector.extract_strided_slice %115 {offsets = [0, 96], sizes = [16, 32], strides = [1, 1]} : vector<16x128xf32> to vector<16x32xf32>
    %126 = math.tanh %125 : vector<16x32xf32>
    %c0_84 = arith.constant 0 : index
    %c0_85 = arith.constant 0 : index
    %127 = vector.load %arg13[%c0_84, %c0_85] : memref<16x32xf32, #tpu.memory_space<vmem>>, vector<16x32xf32>
    %128 = arith.mulf %122, %127 : vector<16x32xf32>
    %129 = arith.mulf %123, %126 : vector<16x32xf32>
    %130 = arith.addf %128, %129 : vector<16x32xf32>
    %131 = math.tanh %130 : vector<16x32xf32>
    %132 = arith.mulf %124, %131 : vector<16x32xf32>
    %c0_86 = arith.constant 0 : index
    %c0_87 = arith.constant 0 : index
    %133 = vector.load %arg13[%c0_86, %c0_87] : memref<16x32xf32, #tpu.memory_space<vmem>>, vector<16x32xf32>
    tpu.vector_store %arg13[%c0_86, %c0_87], %130 {strides = array<i32>} : memref<16x32xf32, #tpu.memory_space<vmem>>, vector<16x32xf32>,
    %c0_88 = arith.constant 0 : index
    %c0_89 = arith.constant 0 : index
    %134 = vector.load %arg12[%c0_88, %c0_89] : memref<16x32xf32, #tpu.memory_space<vmem>>, vector<16x32xf32>
    tpu.vector_store %arg12[%c0_88, %c0_89], %132 {strides = array<i32>} : memref<16x32xf32, #tpu.memory_space<vmem>>, vector<16x32xf32>,
    %135 = vector.extract_strided_slice %132 {offsets = [0, 0], sizes = [8, 32], strides = [1, 1]} : vector<16x32xf32> to vector<8x32xf32>
    %c24_90 = arith.constant 24 : index
    %c0_91 = arith.constant 0 : index
    %136 = vector.load %arg11[%c24_90, %c0_91] : memref<64x64xf32, #tpu.memory_space<vmem>>, vector<8x32xf32>
    tpu.vector_store %arg11[%c24_90, %c0_91], %135 {strides = array<i32>} : memref<64x64xf32, #tpu.memory_space<vmem>>, vector<8x32xf32>,
    %137 = vector.extract_strided_slice %132 {offsets = [8, 0], sizes = [8, 32], strides = [1, 1]} : vector<16x32xf32> to vector<8x32xf32>
    %c32_92 = arith.constant 32 : index
    %c32_93 = arith.constant 32 : index
    %138 = vector.load %arg11[%c32_92, %c32_93] : memref<64x64xf32, #tpu.memory_space<vmem>>, vector<8x32xf32>
    tpu.vector_store %arg11[%c32_92, %c32_93], %137 {strides = array<i32>} : memref<64x64xf32, #tpu.memory_space<vmem>>, vector<8x32xf32>,
    %c32_94 = arith.constant 32 : index
    %c0_95 = arith.constant 0 : index
    %139 = vector.load %arg10[%c32_94, %c0_95] : memref<64x128xf32, #tpu.memory_space<vmem>>, vector<8x128xf32>
    %c24_96 = arith.constant 24 : index
    %c0_97 = arith.constant 0 : index
    %140 = vector.load %arg10[%c24_96, %c0_97] : memref<64x128xf32, #tpu.memory_space<vmem>>, vector<8x128xf32>
    %141 = tpu.concatenate %139, %140 in 0 : vector<8x128xf32>, vector<8x128xf32> -> vector<16x128xf32>
    %c0_98 = arith.constant 0 : index
    %c0_99 = arith.constant 0 : index
    %142 = vector.load %arg12[%c0_98, %c0_99] : memref<16x32xf32, #tpu.memory_space<vmem>>, vector<16x32xf32>
    %c0_100 = arith.constant 0 : index
    %c0_101 = arith.constant 0 : index
    %143 = vector.load %arg3[%c0_100, %c0_101] : memref<32x128xf32, #tpu.memory_space<vmem>>, vector<32x128xf32>
    %cst_102 = arith.constant dense<0.000000e+00> : vector<16x128xf32>
    %144 = tpu.matmul %142, %143, %cst_102 {dimension_numbers = #tpu.dot_dimension_numbers<[1], [0], [0], [1], [0, 0, 1, 1], [], []>} : vector<16x32xf32>, vector<32x128xf32>, vector<16x128xf32> -> vector<16x128xf32>
    %145 = arith.addf %141, %144 : vector<16x128xf32>
    %146 = vector.extract_strided_slice %145 {offsets = [0, 0], sizes = [16, 96], strides = [1, 1]} : vector<16x128xf32> to vector<16x96xf32>
    %147 = arith.negf %146 : vector<16x96xf32>
    %148 = math.exp %147 : vector<16x96xf32>
    %cst_103 = arith.constant 1.000000e+00 : f32
    %149 = vector.broadcast %cst_103 : f32 to vector<16x96xf32>
    %150 = arith.addf %149, %148 : vector<16x96xf32>
    %151 = arith.divf %149, %150 : vector<16x96xf32>
    %152 = vector.extract_strided_slice %151 {offsets = [0, 0], sizes = [16, 32], strides = [1, 1]} : vector<16x96xf32> to vector<16x32xf32>
    %153 = vector.extract_strided_slice %151 {offsets = [0, 32], sizes = [16, 32], strides = [1, 1]} : vector<16x96xf32> to vector<16x32xf32>
    %154 = vector.extract_strided_slice %151 {offsets = [0, 64], sizes = [16, 32], strides = [1, 1]} : vector<16x96xf32> to vector<16x32xf32>
    %155 = vector.extract_strided_slice %145 {offsets = [0, 96], sizes = [16, 32], strides = [1, 1]} : vector<16x128xf32> to vector<16x32xf32>
    %156 = math.tanh %155 : vector<16x32xf32>
    %c0_104 = arith.constant 0 : index
    %c0_105 = arith.constant 0 : index
    %157 = vector.load %arg13[%c0_104, %c0_105] : memref<16x32xf32, #tpu.memory_space<vmem>>, vector<16x32xf32>
    %158 = arith.mulf %152, %157 : vector<16x32xf32>
    %159 = arith.mulf %153, %156 : vector<16x32xf32>
    %160 = arith.addf %158, %159 : vector<16x32xf32>
    %161 = math.tanh %160 : vector<16x32xf32>
    %162 = arith.mulf %154, %161 : vector<16x32xf32>
    %c0_106 = arith.constant 0 : index
    %c0_107 = arith.constant 0 : index
    %163 = vector.load %arg13[%c0_106, %c0_107] : memref<16x32xf32, #tpu.memory_space<vmem>>, vector<16x32xf32>
    tpu.vector_store %arg13[%c0_106, %c0_107], %160 {strides = array<i32>} : memref<16x32xf32, #tpu.memory_space<vmem>>, vector<16x32xf32>,
    %c0_108 = arith.constant 0 : index
    %c0_109 = arith.constant 0 : index
    %164 = vector.load %arg12[%c0_108, %c0_109] : memref<16x32xf32, #tpu.memory_space<vmem>>, vector<16x32xf32>
    tpu.vector_store %arg12[%c0_108, %c0_109], %162 {strides = array<i32>} : memref<16x32xf32, #tpu.memory_space<vmem>>, vector<16x32xf32>,
    %165 = vector.extract_strided_slice %162 {offsets = [0, 0], sizes = [8, 32], strides = [1, 1]} : vector<16x32xf32> to vector<8x32xf32>
    %c32_110 = arith.constant 32 : index
    %c0_111 = arith.constant 0 : index
    %166 = vector.load %arg11[%c32_110, %c0_111] : memref<64x64xf32, #tpu.memory_space<vmem>>, vector<8x32xf32>
    tpu.vector_store %arg11[%c32_110, %c0_111], %165 {strides = array<i32>} : memref<64x64xf32, #tpu.memory_space<vmem>>, vector<8x32xf32>,
    %167 = vector.extract_strided_slice %162 {offsets = [8, 0], sizes = [8, 32], strides = [1, 1]} : vector<16x32xf32> to vector<8x32xf32>
    %c24_112 = arith.constant 24 : index
    %c32_113 = arith.constant 32 : index
    %168 = vector.load %arg11[%c24_112, %c32_113] : memref<64x64xf32, #tpu.memory_space<vmem>>, vector<8x32xf32>
    tpu.vector_store %arg11[%c24_112, %c32_113], %167 {strides = array<i32>} : memref<64x64xf32, #tpu.memory_space<vmem>>, vector<8x32xf32>,
    %c40_114 = arith.constant 40 : index
    %c0_115 = arith.constant 0 : index
    %169 = vector.load %arg10[%c40_114, %c0_115] : memref<64x128xf32, #tpu.memory_space<vmem>>, vector<8x128xf32>
    %c16_116 = arith.constant 16 : index
    %c0_117 = arith.constant 0 : index
    %170 = vector.load %arg10[%c16_116, %c0_117] : memref<64x128xf32, #tpu.memory_space<vmem>>, vector<8x128xf32>
    %171 = tpu.concatenate %169, %170 in 0 : vector<8x128xf32>, vector<8x128xf32> -> vector<16x128xf32>
    %c0_118 = arith.constant 0 : index
    %c0_119 = arith.constant 0 : index
    %172 = vector.load %arg12[%c0_118, %c0_119] : memref<16x32xf32, #tpu.memory_space<vmem>>, vector<16x32xf32>
    %c0_120 = arith.constant 0 : index
    %c0_121 = arith.constant 0 : index
    %173 = vector.load %arg3[%c0_120, %c0_121] : memref<32x128xf32, #tpu.memory_space<vmem>>, vector<32x128xf32>
    %cst_122 = arith.constant dense<0.000000e+00> : vector<16x128xf32>
    %174 = tpu.matmul %172, %173, %cst_122 {dimension_numbers = #tpu.dot_dimension_numbers<[1], [0], [0], [1], [0, 0, 1, 1], [], []>} : vector<16x32xf32>, vector<32x128xf32>, vector<16x128xf32> -> vector<16x128xf32>
    %175 = arith.addf %171, %174 : vector<16x128xf32>
    %176 = vector.extract_strided_slice %175 {offsets = [0, 0], sizes = [16, 96], strides = [1, 1]} : vector<16x128xf32> to vector<16x96xf32>
    %177 = arith.negf %176 : vector<16x96xf32>
    %178 = math.exp %177 : vector<16x96xf32>
    %cst_123 = arith.constant 1.000000e+00 : f32
    %179 = vector.broadcast %cst_123 : f32 to vector<16x96xf32>
    %180 = arith.addf %179, %178 : vector<16x96xf32>
    %181 = arith.divf %179, %180 : vector<16x96xf32>
    %182 = vector.extract_strided_slice %181 {offsets = [0, 0], sizes = [16, 32], strides = [1, 1]} : vector<16x96xf32> to vector<16x32xf32>
    %183 = vector.extract_strided_slice %181 {offsets = [0, 32], sizes = [16, 32], strides = [1, 1]} : vector<16x96xf32> to vector<16x32xf32>
    %184 = vector.extract_strided_slice %181 {offsets = [0, 64], sizes = [16, 32], strides = [1, 1]} : vector<16x96xf32> to vector<16x32xf32>
    %185 = vector.extract_strided_slice %175 {offsets = [0, 96], sizes = [16, 32], strides = [1, 1]} : vector<16x128xf32> to vector<16x32xf32>
    %186 = math.tanh %185 : vector<16x32xf32>
    %c0_124 = arith.constant 0 : index
    %c0_125 = arith.constant 0 : index
    %187 = vector.load %arg13[%c0_124, %c0_125] : memref<16x32xf32, #tpu.memory_space<vmem>>, vector<16x32xf32>
    %188 = arith.mulf %182, %187 : vector<16x32xf32>
    %189 = arith.mulf %183, %186 : vector<16x32xf32>
    %190 = arith.addf %188, %189 : vector<16x32xf32>
    %191 = math.tanh %190 : vector<16x32xf32>
    %192 = arith.mulf %184, %191 : vector<16x32xf32>
    %c0_126 = arith.constant 0 : index
    %c0_127 = arith.constant 0 : index
    %193 = vector.load %arg13[%c0_126, %c0_127] : memref<16x32xf32, #tpu.memory_space<vmem>>, vector<16x32xf32>
    tpu.vector_store %arg13[%c0_126, %c0_127], %190 {strides = array<i32>} : memref<16x32xf32, #tpu.memory_space<vmem>>, vector<16x32xf32>,
    %c0_128 = arith.constant 0 : index
    %c0_129 = arith.constant 0 : index
    %194 = vector.load %arg12[%c0_128, %c0_129] : memref<16x32xf32, #tpu.memory_space<vmem>>, vector<16x32xf32>
    tpu.vector_store %arg12[%c0_128, %c0_129], %192 {strides = array<i32>} : memref<16x32xf32, #tpu.memory_space<vmem>>, vector<16x32xf32>,
    %195 = vector.extract_strided_slice %192 {offsets = [0, 0], sizes = [8, 32], strides = [1, 1]} : vector<16x32xf32> to vector<8x32xf32>
    %c40_130 = arith.constant 40 : index
    %c0_131 = arith.constant 0 : index
    %196 = vector.load %arg11[%c40_130, %c0_131] : memref<64x64xf32, #tpu.memory_space<vmem>>, vector<8x32xf32>
    tpu.vector_store %arg11[%c40_130, %c0_131], %195 {strides = array<i32>} : memref<64x64xf32, #tpu.memory_space<vmem>>, vector<8x32xf32>,
    %197 = vector.extract_strided_slice %192 {offsets = [8, 0], sizes = [8, 32], strides = [1, 1]} : vector<16x32xf32> to vector<8x32xf32>
    %c16_132 = arith.constant 16 : index
    %c32_133 = arith.constant 32 : index
    %198 = vector.load %arg11[%c16_132, %c32_133] : memref<64x64xf32, #tpu.memory_space<vmem>>, vector<8x32xf32>
    tpu.vector_store %arg11[%c16_132, %c32_133], %197 {strides = array<i32>} : memref<64x64xf32, #tpu.memory_space<vmem>>, vector<8x32xf32>,
    %c48_134 = arith.constant 48 : index
    %c0_135 = arith.constant 0 : index
    %199 = vector.load %arg10[%c48_134, %c0_135] : memref<64x128xf32, #tpu.memory_space<vmem>>, vector<8x128xf32>
    %c8_136 = arith.constant 8 : index
    %c0_137 = arith.constant 0 : index
    %200 = vector.load %arg10[%c8_136, %c0_137] : memref<64x128xf32, #tpu.memory_space<vmem>>, vector<8x128xf32>
    %201 = tpu.concatenate %199, %200 in 0 : vector<8x128xf32>, vector<8x128xf32> -> vector<16x128xf32>
    %c0_138 = arith.constant 0 : index
    %c0_139 = arith.constant 0 : index
    %202 = vector.load %arg12[%c0_138, %c0_139] : memref<16x32xf32, #tpu.memory_space<vmem>>, vector<16x32xf32>
    %c0_140 = arith.constant 0 : index
    %c0_141 = arith.constant 0 : index
    %203 = vector.load %arg3[%c0_140, %c0_141] : memref<32x128xf32, #tpu.memory_space<vmem>>, vector<32x128xf32>
    %cst_142 = arith.constant dense<0.000000e+00> : vector<16x128xf32>
    %204 = tpu.matmul %202, %203, %cst_142 {dimension_numbers = #tpu.dot_dimension_numbers<[1], [0], [0], [1], [0, 0, 1, 1], [], []>} : vector<16x32xf32>, vector<32x128xf32>, vector<16x128xf32> -> vector<16x128xf32>
    %205 = arith.addf %201, %204 : vector<16x128xf32>
    %206 = vector.extract_strided_slice %205 {offsets = [0, 0], sizes = [16, 96], strides = [1, 1]} : vector<16x128xf32> to vector<16x96xf32>
    %207 = arith.negf %206 : vector<16x96xf32>
    %208 = math.exp %207 : vector<16x96xf32>
    %cst_143 = arith.constant 1.000000e+00 : f32
    %209 = vector.broadcast %cst_143 : f32 to vector<16x96xf32>
    %210 = arith.addf %209, %208 : vector<16x96xf32>
    %211 = arith.divf %209, %210 : vector<16x96xf32>
    %212 = vector.extract_strided_slice %211 {offsets = [0, 0], sizes = [16, 32], strides = [1, 1]} : vector<16x96xf32> to vector<16x32xf32>
    %213 = vector.extract_strided_slice %211 {offsets = [0, 32], sizes = [16, 32], strides = [1, 1]} : vector<16x96xf32> to vector<16x32xf32>
    %214 = vector.extract_strided_slice %211 {offsets = [0, 64], sizes = [16, 32], strides = [1, 1]} : vector<16x96xf32> to vector<16x32xf32>
    %215 = vector.extract_strided_slice %205 {offsets = [0, 96], sizes = [16, 32], strides = [1, 1]} : vector<16x128xf32> to vector<16x32xf32>
    %216 = math.tanh %215 : vector<16x32xf32>
    %c0_144 = arith.constant 0 : index
    %c0_145 = arith.constant 0 : index
    %217 = vector.load %arg13[%c0_144, %c0_145] : memref<16x32xf32, #tpu.memory_space<vmem>>, vector<16x32xf32>
    %218 = arith.mulf %212, %217 : vector<16x32xf32>
    %219 = arith.mulf %213, %216 : vector<16x32xf32>
    %220 = arith.addf %218, %219 : vector<16x32xf32>
    %221 = math.tanh %220 : vector<16x32xf32>
    %222 = arith.mulf %214, %221 : vector<16x32xf32>
    %c0_146 = arith.constant 0 : index
    %c0_147 = arith.constant 0 : index
    %223 = vector.load %arg13[%c0_146, %c0_147] : memref<16x32xf32, #tpu.memory_space<vmem>>, vector<16x32xf32>
    tpu.vector_store %arg13[%c0_146, %c0_147], %220 {strides = array<i32>} : memref<16x32xf32, #tpu.memory_space<vmem>>, vector<16x32xf32>,
    %c0_148 = arith.constant 0 : index
    %c0_149 = arith.constant 0 : index
    %224 = vector.load %arg12[%c0_148, %c0_149] : memref<16x32xf32, #tpu.memory_space<vmem>>, vector<16x32xf32>
    tpu.vector_store %arg12[%c0_148, %c0_149], %222 {strides = array<i32>} : memref<16x32xf32, #tpu.memory_space<vmem>>, vector<16x32xf32>,
    %225 = vector.extract_strided_slice %222 {offsets = [0, 0], sizes = [8, 32], strides = [1, 1]} : vector<16x32xf32> to vector<8x32xf32>
    %c48_150 = arith.constant 48 : index
    %c0_151 = arith.constant 0 : index
    %226 = vector.load %arg11[%c48_150, %c0_151] : memref<64x64xf32, #tpu.memory_space<vmem>>, vector<8x32xf32>
    tpu.vector_store %arg11[%c48_150, %c0_151], %225 {strides = array<i32>} : memref<64x64xf32, #tpu.memory_space<vmem>>, vector<8x32xf32>,
    %227 = vector.extract_strided_slice %222 {offsets = [8, 0], sizes = [8, 32], strides = [1, 1]} : vector<16x32xf32> to vector<8x32xf32>
    %c8_152 = arith.constant 8 : index
    %c32_153 = arith.constant 32 : index
    %228 = vector.load %arg11[%c8_152, %c32_153] : memref<64x64xf32, #tpu.memory_space<vmem>>, vector<8x32xf32>
    tpu.vector_store %arg11[%c8_152, %c32_153], %227 {strides = array<i32>} : memref<64x64xf32, #tpu.memory_space<vmem>>, vector<8x32xf32>,
    %c56_154 = arith.constant 56 : index
    %c0_155 = arith.constant 0 : index
    %229 = vector.load %arg10[%c56_154, %c0_155] : memref<64x128xf32, #tpu.memory_space<vmem>>, vector<8x128xf32>
    %c0_156 = arith.constant 0 : index
    %c0_157 = arith.constant 0 : index
    %230 = vector.load %arg10[%c0_156, %c0_157] : memref<64x128xf32, #tpu.memory_space<vmem>>, vector<8x128xf32>
    %231 = tpu.concatenate %229, %230 in 0 : vector<8x128xf32>, vector<8x128xf32> -> vector<16x128xf32>
    %c0_158 = arith.constant 0 : index
    %c0_159 = arith.constant 0 : index
    %232 = vector.load %arg12[%c0_158, %c0_159] : memref<16x32xf32, #tpu.memory_space<vmem>>, vector<16x32xf32>
    %c0_160 = arith.constant 0 : index
    %c0_161 = arith.constant 0 : index
    %233 = vector.load %arg3[%c0_160, %c0_161] : memref<32x128xf32, #tpu.memory_space<vmem>>, vector<32x128xf32>
    %cst_162 = arith.constant dense<0.000000e+00> : vector<16x128xf32>
    %234 = tpu.matmul %232, %233, %cst_162 {dimension_numbers = #tpu.dot_dimension_numbers<[1], [0], [0], [1], [0, 0, 1, 1], [], []>} : vector<16x32xf32>, vector<32x128xf32>, vector<16x128xf32> -> vector<16x128xf32>
    %235 = arith.addf %231, %234 : vector<16x128xf32>
    %236 = vector.extract_strided_slice %235 {offsets = [0, 0], sizes = [16, 96], strides = [1, 1]} : vector<16x128xf32> to vector<16x96xf32>
    %237 = arith.negf %236 : vector<16x96xf32>
    %238 = math.exp %237 : vector<16x96xf32>
    %cst_163 = arith.constant 1.000000e+00 : f32
    %239 = vector.broadcast %cst_163 : f32 to vector<16x96xf32>
    %240 = arith.addf %239, %238 : vector<16x96xf32>
    %241 = arith.divf %239, %240 : vector<16x96xf32>
    %242 = vector.extract_strided_slice %241 {offsets = [0, 0], sizes = [16, 32], strides = [1, 1]} : vector<16x96xf32> to vector<16x32xf32>
    %243 = vector.extract_strided_slice %241 {offsets = [0, 32], sizes = [16, 32], strides = [1, 1]} : vector<16x96xf32> to vector<16x32xf32>
    %244 = vector.extract_strided_slice %241 {offsets = [0, 64], sizes = [16, 32], strides = [1, 1]} : vector<16x96xf32> to vector<16x32xf32>
    %245 = vector.extract_strided_slice %235 {offsets = [0, 96], sizes = [16, 32], strides = [1, 1]} : vector<16x128xf32> to vector<16x32xf32>
    %246 = math.tanh %245 : vector<16x32xf32>
    %c0_164 = arith.constant 0 : index
    %c0_165 = arith.constant 0 : index
    %247 = vector.load %arg13[%c0_164, %c0_165] : memref<16x32xf32, #tpu.memory_space<vmem>>, vector<16x32xf32>
    %248 = arith.mulf %242, %247 : vector<16x32xf32>
    %249 = arith.mulf %243, %246 : vector<16x32xf32>
    %250 = arith.addf %248, %249 : vector<16x32xf32>
    %251 = math.tanh %250 : vector<16x32xf32>
    %252 = arith.mulf %244, %251 : vector<16x32xf32>
    %c0_166 = arith.constant 0 : index
    %c0_167 = arith.constant 0 : index
    %253 = vector.load %arg13[%c0_166, %c0_167] : memref<16x32xf32, #tpu.memory_space<vmem>>, vector<16x32xf32>
    tpu.vector_store %arg13[%c0_166, %c0_167], %250 {strides = array<i32>} : memref<16x32xf32, #tpu.memory_space<vmem>>, vector<16x32xf32>,
    %c0_168 = arith.constant 0 : index
    %c0_169 = arith.constant 0 : index
    %254 = vector.load %arg12[%c0_168, %c0_169] : memref<16x32xf32, #tpu.memory_space<vmem>>, vector<16x32xf32>
    tpu.vector_store %arg12[%c0_168, %c0_169], %252 {strides = array<i32>} : memref<16x32xf32, #tpu.memory_space<vmem>>, vector<16x32xf32>,
    %255 = vector.extract_strided_slice %252 {offsets = [0, 0], sizes = [8, 32], strides = [1, 1]} : vector<16x32xf32> to vector<8x32xf32>
    %c56_170 = arith.constant 56 : index
    %c0_171 = arith.constant 0 : index
    %256 = vector.load %arg11[%c56_170, %c0_171] : memref<64x64xf32, #tpu.memory_space<vmem>>, vector<8x32xf32>
    tpu.vector_store %arg11[%c56_170, %c0_171], %255 {strides = array<i32>} : memref<64x64xf32, #tpu.memory_space<vmem>>, vector<8x32xf32>,
    %257 = vector.extract_strided_slice %252 {offsets = [8, 0], sizes = [8, 32], strides = [1, 1]} : vector<16x32xf32> to vector<8x32xf32>
    %c0_172 = arith.constant 0 : index
    %c32_173 = arith.constant 32 : index
    %258 = vector.load %arg11[%c0_172, %c32_173] : memref<64x64xf32, #tpu.memory_space<vmem>>, vector<8x32xf32>
    tpu.vector_store %arg11[%c0_172, %c32_173], %257 {strides = array<i32>} : memref<64x64xf32, #tpu.memory_space<vmem>>, vector<8x32xf32>,
    %c0_174 = arith.constant 0 : index
    %c0_175 = arith.constant 0 : index
    %259 = vector.load %arg11[%c0_174, %c0_175] : memref<64x64xf32, #tpu.memory_space<vmem>>, vector<64x64xf32>
    %c0_176 = arith.constant 0 : index
    %c0_177 = arith.constant 0 : index
    %260 = vector.load %arg5[%c0_176, %c0_177] : memref<64x8xf32, #tpu.memory_space<vmem>>, vector<64x8xf32>
    %cst_178 = arith.constant dense<0.000000e+00> : vector<64x8xf32>
    %261 = tpu.matmul %259, %260, %cst_178 {dimension_numbers = #tpu.dot_dimension_numbers<[1], [0], [0], [1], [0, 0, 1, 1], [], []>} : vector<64x64xf32>, vector<64x8xf32>, vector<64x8xf32> -> vector<64x8xf32>
    %c0_179 = arith.constant 0 : index
    %c0_180 = arith.constant 0 : index
    %262 = vector.load %arg6[%c0_179, %c0_180] : memref<1x8xf32, #tpu.memory_space<vmem>>, vector<1x8xf32>
    %263 = vector.broadcast %262 : vector<1x8xf32> to vector<64x8xf32>
    %264 = arith.addf %261, %263 : vector<64x8xf32>
    %c0_181 = arith.constant 0 : index
    %c0_182 = arith.constant 0 : index
    %265 = vector.load %arg9[%c0_181, %c0_182] : memref<64x8xf32, #tpu.memory_space<vmem>>, vector<64x8xf32>
    tpu.vector_store %arg9[%c0_181, %c0_182], %264 {strides = array<i32>} : memref<64x8xf32, #tpu.memory_space<vmem>>, vector<64x8xf32>,
    return
  }
  func.func @transform_0(%arg0: i32) -> (i32, i32) {
    %c0_i32 = arith.constant 0 : i32
    %c0_i32_0 = arith.constant 0 : i32
    return %arg0, %c0_i32 : i32, i32
  }
  func.func @transform_1(%arg0: i32) -> (i32, i32) {
    %c0_i32 = arith.constant 0 : i32
    %c0_i32_0 = arith.constant 0 : i32
    %c0_i32_1 = arith.constant 0 : i32
    return %c0_i32, %c0_i32_0 : i32, i32
  }
  func.func @transform_2(%arg0: i32) -> (i32, i32) {
    %c0_i32 = arith.constant 0 : i32
    %c0_i32_0 = arith.constant 0 : i32
    %c0_i32_1 = arith.constant 0 : i32
    return %c0_i32, %c0_i32_0 : i32, i32
  }
  func.func @transform_3(%arg0: i32) -> (i32, i32) {
    %c0_i32 = arith.constant 0 : i32
    %c0_i32_0 = arith.constant 0 : i32
    %c0_i32_1 = arith.constant 0 : i32
    return %c0_i32, %c0_i32_0 : i32, i32
  }
  func.func @transform_4(%arg0: i32) -> (i32, i32) {
    %c0_i32 = arith.constant 0 : i32
    %c0_i32_0 = arith.constant 0 : i32
    %c0_i32_1 = arith.constant 0 : i32
    return %c0_i32, %c0_i32_0 : i32, i32
  }
  func.func @transform_5(%arg0: i32) -> (i32, i32) {
    %c0_i32 = arith.constant 0 : i32
    %c0_i32_0 = arith.constant 0 : i32
    %c0_i32_1 = arith.constant 0 : i32
    return %c0_i32, %c0_i32_0 : i32, i32
  }
  func.func @transform_6(%arg0: i32) -> (i32, i32) {
    %c0_i32 = arith.constant 0 : i32
    %c0_i32_0 = arith.constant 0 : i32
    %c0_i32_1 = arith.constant 0 : i32
    return %c0_i32, %c0_i32_0 : i32, i32
  }
  func.func @transform_7(%arg0: i32) -> (i32, i32) {
    %c0_i32 = arith.constant 0 : i32
    %c0_i32_0 = arith.constant 0 : i32
    %c0_i32_1 = arith.constant 0 : i32
    return %c0_i32, %c0_i32_0 : i32, i32
  }
  func.func @transform_8(%arg0: i32) -> (i32, i32) {
    %c0_i32 = arith.constant 0 : i32
    %c0_i32_0 = arith.constant 0 : i32
    return %arg0, %c0_i32 : i32, i32
  }
}

</mosaic_0001>

<bundles_post_ra>
// kernel: tpu_custom_call.1
= control target key start
LH: loop header
LB: loop body
LE: loop exit
PB: predicated region body
PF: predicated region fallthrough
CT: control target
= control target key end

     0   :  { %vm46_vm0 = vcmask 130048   ;;  %vm184_vm1 = vcmask 261120   ;;  %v2023_v3 = vmov 0.0   ;;  %vm360_vm2 = vcmask 523520   ;;  %s2482_s1 = inlined_call_operand.vmem [shape: f32[16,128], index: 1, kind: input, shape index: {}]   ;;  %s2483_s0 = inlined_call_operand.vmem [shape: f32[64,16], index: 0, kind: input, shape index: {}]   ;;  %s2484_s2 = inlined_call_operand.vmem [shape: f32[32,128], index: 2, kind: input, shape index: {}]   ;;  %s2485_s6 = inlined_call_operand.vmem [shape: f32[1,32], index: 6, kind: input, shape index: {}]   ;;  %s2486_s7 = inlined_call_operand.vmem [shape: f32[1,32], index: 7, kind: input, shape index: {}]   ;;  %s2487_s3 = inlined_call_operand.vmem [shape: f32[1,128], index: 3, kind: input, shape index: {}]   ;;  %s2488_s4 = inlined_call_operand.vmem [shape: f32[64,8], index: 4, kind: input, shape index: {}]   ;;  %s2489_s5 = inlined_call_operand.vmem [shape: f32[1,8], index: 5, kind: input, shape index: {}]   ;;  %s2490_s8 = inlined_call_operand.vmem [shape: f32[64,8], index: 8, kind: output, shape index: {}]  }
   0x1   :  { %v38_v0 = vld [vmem:[%s2482_s1 + $0x8] sm:$0xff]  ;;  %v37_v1 = vld [vmem:[%s2482_s1] sm:$0xff]  ;;  %185 = vst.msk [vmem:[#allocation4] sm:$0xff] %vm184_vm1, %v2023_v3  ;;  %186 = vst.msk [vmem:[#allocation5] sm:$0xff] %vm184_vm1, %v2023_v3  ;;  %vm1491_vm3 = vcmask 523264   ;;  %vm1621_vm4 = vcmask 64512  }
   0x2   :  { %v29_v2 = vld [vmem:[%s2483_s0] sm:$0xff]  ;;  %1760 = vmatprep.subr.mxu1 %v38_v0  ;;  %v2086_v4 = vld [vmem:[%s2484_s2 + $0x18] sm:$0xff]  ;;  %v30_v5 = vld [vmem:[%s2483_s0 + $0x8] sm:$0xff] }
   0x3   :  { %1764 = vmatprep.mubr.msk.f32.mxu1 %vm46_vm0, %v29_v2  ;;  %1761 = vmatpush3.msra.mxu1 %v38_v0  ;;  %v31_v6 = vld [vmem:[%s2483_s0 + $0x10] sm:$0xff]  ;;  %v1643_v8 = vld [vmem:[%s2485_s6] ss:$0 sm:$0xff]  ;;  %v32_v9 = vld [vmem:[%s2483_s0 + $0x18] sm:$0xff] }
   0x4   :  { %1798 = vmatprep.subr.mxu0 %v2086_v4  ;;  %1762 = vmatprep.subr.mxu1 %v37_v1  ;;  %v2098_v7 = vld [vmem:[%s2484_s2 + $0x10] sm:$0xff]  ;;  %194 = vst.msk [vmem:[#allocation4 + $0x8] sm:$0xff] %vm184_vm1, %v1643_v8  ;;  %v2116_v10 = vld [vmem:[%s2484_s2 + $0x8] sm:$0xff]  ;;  %v33_v11 = vld [vmem:[%s2483_s0 + $0x20] sm:$0xff] }
   0x5   :  { %1799 = vmatpush3.msra.mxu0 %v2086_v4  ;;  %1763 = vmatpush3.msra.mxu1 %v37_v1  ;;  %v2127_v12 = vld [vmem:[%s2484_s2] sm:$0xff]  ;;  %v34_v13 = vld [vmem:[%s2483_s0 + $0x28] sm:$0xff]  ;;  %v35_v14 = vld [vmem:[%s2483_s0 + $0x30] sm:$0xff] }
   0x6   :  { %1800 = vmatprep.subr.mxu0 %v2098_v7  ;;  %1765 = vmatmul.mubr.msk.f32.vlgmr.msra.gmra.mxu1 %vm46_vm0, %v30_v5  ;;  %v36_v15 = vld [vmem:[%s2483_s0 + $0x38] sm:$0xff]  ;;  %v1644_v18 = vld [vmem:[%s2486_s7] ss:$0 sm:$0xff]  ;;  %s2025_s7 = smov 96  }
   0x7   :  { %1776 = vmatprep.subr.mxu1 %v2086_v4  ;;  %1767 = vmatprep.mubr.msk.f32.mxu1 %vm46_vm0, %v31_v6  ;;  %202 = vst.msk [vmem:[#allocation5 + $0x8] sm:$0xff] %vm184_vm1, %v1644_v18  ;;  %v1634_v19 = vld [vmem:[%s2487_s3] ss:$0 sm:$0xff]  ;;  %s2024_s3 = smov 64  }
   0x8   :  { %1777 = vmatpush3.msra.mxu1 %v2086_v4  ;;  %1801 = vmatpush3.msra.mxu0 %v2098_v7  ;;  %v205_v16 = vld [vmem:[#allocation4] sm:$0xff]  ;;  %v308_v54 = vld [vmem:[#allocation5] sm:$0xff] }
   0x9   :  { %1778 = vmatprep.subr.mxu1 %v2098_v7  ;;  %1802 = vmatprep.subr.mxu0 %v2116_v10 }
   0xa   :  { %1779 = vmatpush3.msra.mxu1 %v2098_v7  ;;  %1803 = vmatpush3.msra.mxu0 %v2116_v10 }
   0xb   :  { %1768 = vmatmul.mubr.msk.f32.gmra.mxu1 %vm46_vm0, %v32_v9  ;;  %1780 = vmatprep.subr.mxu1 %v2116_v10  ;;  %v206_v17 = vld [vmem:[#allocation4 + $0x8] sm:$0xff] }
   0xc   :  { %1770 = vmatprep.mubr.msk.f32.mxu1 %vm46_vm0, %v33_v11  ;;  %1781 = vmatpush3.msra.mxu1 %v2116_v10 }
   0xd   :  { %1782 = vmatprep.subr.mxu1 %v2127_v12  ;;  %1804 = vmatprep.subr.mxu0 %v2127_v12 }
   0xe   :  { %1783 = vmatpush3.msra.mxu1 %v2127_v12  ;;  %1805 = vmatpush3.msra.mxu0 %v2127_v12  ;;  %v309_v57 = vld [vmem:[#allocation5 + $0x8] sm:$0xff] }
   0xf   :  { %1771 = vmatmul.mubr.msk.f32.gmra.mxu1 %vm46_vm0, %v34_v13  ;;  %1787 = vmatprep.subr.mxu1 %v2086_v4 }
  0x10   :  { %1773 = vmatprep.mubr.msk.f32.mxu1 %vm46_vm0, %v35_v14  ;;  %1820 = vmatprep.subr.mxu0 %v2086_v4 }
  0x13   :  { %1774 = vmatmul.mubr.msk.f32.gmra.mxu1 %vm46_vm0, %v36_v15 }
  0x14   :  { %1784 = vmatprep.mubr.msk.f32.mxu1 %vm184_vm1, %v205_v16 }
  0x17   :  { %1785 = vmatmul.mubr.msk.f32.vlgmr.msra.gmra.mxu1 %vm184_vm1, %v206_v17 }
  0x18   :  { %1788 = vmatpush3.msra.mxu1 %v2086_v4 }
  0x19   :  { %1789 = vmatprep.subr.mxu1 %v2098_v7 }
  0x1a   :  { %1790 = vmatpush3.msra.mxu1 %v2098_v7 }
  0x1b   :  { %1791 = vmatprep.subr.mxu1 %v2116_v10 }
  0x1c   :  { %1792 = vmatpush3.msra.mxu1 %v2116_v10 }
  0x1d   :  { %1793 = vmatprep.subr.mxu1 %v2127_v12 }
  0x1e   :  { %1794 = vmatpush3.msra.mxu1 %v2127_v12 }
  0x1f   :  { %1809 = vmatprep.subr.mxu1 %v2086_v4 }
  0xc6   :  { %v1766_v20 = vpop.f32.mrf.mxu1 }
  0xc7   :  { %v2170_v21 = vadd.f32 %v1766_v20, %v1634_v19 }
  0xc8   :  { %v137_v22 = vpop.f32.mrf.mxu1 }
  0xc9   :  { %v2182_v35 = vadd.f32 %v1634_v19, %v137_v22 }
  0xcb   :  { %v1769_v23 = vpop.f32.mrf.mxu1 }
  0xcc   :  { %v2172_v24 = vadd.f32 %v1769_v23, %v1634_v19 }
  0xcd   :  { %v147_v25 = vpop.f32.mrf.mxu1 }
  0xce   :  { %v2174_v26 = vadd.f32 %v1634_v19, %v147_v25 }
  0xcf   :  { %v1772_v27 = vpop.f32.mrf.mxu1 }
  0xd0   :  { %v2176_v28 = vadd.f32 %v1772_v27, %v1634_v19 }
  0xd1   :  { %v157_v29 = vpop.f32.mrf.mxu1 }
  0xd2   :  { %v2178_v30 = vadd.f32 %v1634_v19, %v157_v29 }
  0xd3   :  { %v1775_v31 = vpop.f32.mrf.mxu1 }
  0xd4   :  { %v2185_v38 = vadd.f32 %v1775_v31, %v1634_v19 }
  0xd5   :  { %v167_v32 = vpop.f32.mrf.mxu1 }
  0xd6   :  { %v2180_v33 = vadd.f32 %v1634_v19, %v167_v32 }
  0xd7   :  { %v1786_v34 = vpop.f32.mrf.mxu1 }
  0xd8   :  { %v293_v39 = vadd.f32 %v1786_v34, %v2185_v38 }
  0xd9   :  { %v283_v36 = vpop.f32.mrf.mxu1 }
  0xda   :  { %v292_v37 = vadd.f32 %v283_v36, %v2182_v35  ;;  %v1648_v43 = vmul.f32 -1.442695, %v293_v39 }
  0xdc   :  { %1895 = vtanh.f32 %v292_v37  ;;  %v1647_v42 = vmul.f32 -1.442695, %v292_v37 }
  0xdd   :  { %1897 = vtanh.f32 %v293_v39 }
  0xde   :  { %1899 = vpow2.f32 %v1647_v42 }
  0xdf   :  { %1901 = vpow2.f32 %v1648_v43 }
  0xe9   :  { %v1896_v40 = vpop.eup %1895 }
  0xea   :  { %314 = vrot.lane.b32.xlu0 %v1896_v40, %s2024_s3  ;;  %v1898_v41 = vpop.eup %1897 }
  0xeb   :  { %v1900_v44 = vpop.eup %1899 }
  0xec   :  { %v300_v45 = vadd.f32 1.0, %v1900_v44  ;;  %v1902_v46 = vpop.eup %1901 }
  0xed   :  { %v301_v47 = vadd.f32 1.0, %v1902_v46 }
  0xee   :  { %316 = vrot.lane.b32.xlu0 %v1898_v41, %s2024_s3  ;;  %1903 = vrcp.f32 %v300_v45 }
  0xef   :  { %1905 = vrcp.f32 %v301_v47 }
  0xfb   :  { %v1904_v48 = vpop.eup %1903 }
  0xfc   :  { %v1906_v51 = vpop.eup %1905  ;;  %v310_v55 = vmul.f32 %v1904_v48, %v308_v54 }
  0xfd   :  { %v311_v59 = vmul.f32 %v1906_v51, %v309_v57 }
 0x15c   :  { %v315_v49 = vpop.permute.xlu0 %314 }
 0x15d   :  { %v320_v50 = vmul.f32 %v1904_v48, %v315_v49 }
 0x15f   :  { %324 = vrot.lane.b32.xlu1 %v320_v50, %s2025_s7 }
 0x160   :  { %v317_v52 = vpop.permute.xlu0 %316 }
 0x161   :  { %v321_v53 = vmul.f32 %v1906_v51, %v317_v52 }
 0x163   :  { %326 = vrot.lane.b32.xlu1 %v321_v53, %s2025_s7 }
 0x1d1   :  { %v325_v56 = vpop.permute.xlu1 %324 }
 0x1d2   :  { %v330_v58 = vadd.f32 %v325_v56, %v310_v55 }
 0x1d4   :  { %1907 = vtanh.f32 %v330_v58  ;;  %344 = vst.msk [vmem:[#allocation5] sm:$0xff] %vm184_vm1, %v330_v58 }
 0x1d5   :  { %v327_v60 = vpop.permute.xlu1 %326 }
 0x1d6   :  { %v331_v61 = vadd.f32 %v327_v60, %v311_v59 }
 0x1d8   :  { %1909 = vtanh.f32 %v331_v61  ;;  %345 = vst.msk [vmem:[#allocation5 + $0x8] sm:$0xff] %vm184_vm1, %v331_v61 }
 0x1db   :  { %v467_v42 = vld [vmem:[#allocation5] sm:$0xff] }
 0x1df   :  { %v468_v37 = vld [vmem:[#allocation5 + $0x8] sm:$0xff] }
 0x1e1   :  { %v1908_v62 = vpop.eup %1907 }
 0x1e2   :  { %336 = vrot.lane.b32.xlu0 %v1908_v62, %s2024_s3 }
 0x1e5   :  { %v1910_v63 = vpop.eup %1909 }
 0x1e6   :  { %338 = vrot.lane.b32.xlu1 %v1910_v63, %s2024_s3 }
 0x254   :  { %v337_v0 = vpop.permute.xlu0 %336 }
 0x255   :  { %v342_v1 = vmul.f32 %v1904_v48, %v337_v0 }
 0x257   :  { %348 = vrot.lane.b32.xlu0 %v342_v1, %s2024_s3 }
 0x258   :  { %v339_v2 = vpop.permute.xlu1 %338 }
 0x259   :  { %v2197_v3 = vmul.f32 %v1906_v51, %v339_v2 }
 0x25b   :  { %350 = vrot.lane.b32.xlu1 %v2197_v3, %s2024_s3 }
 0x2c9   :  { %v349_v5 = vpop.permute.xlu0 %348 }
 0x2ca   :  { %354 = vst.msk [vmem:[#allocation4] sm:$0xff] %vm184_vm1, %v349_v5  ;;  %356 = vst.msk [vmem:[#allocation3] sm:$0xff] %vm184_vm1, %v349_v5 }
 0x2cd   :  { %v351_v6 = vpop.permute.xlu1 %350 }
 0x2ce   :  { %355 = vst.msk [vmem:[#allocation4 + $0x8] sm:$0xff] %vm184_vm1, %v351_v6 }
 0x2d1   :  { %v364_v8 = vld [vmem:[#allocation4] sm:$0xff] }
 0x2d2   :  { %1795 = vmatprep.mubr.msk.f32.mxu1 %vm184_vm1, %v364_v8 }
 0x2d5   :  { %v365_v9 = vld [vmem:[#allocation4 + $0x8] sm:$0xff] }
 0x2d6   :  { %1796 = vmatmul.mubr.msk.f32.vlgmr.msra.gmra.mxu1 %vm184_vm1, %v365_v9 }
 0x2d7   :  { %1810 = vmatpush3.msra.mxu1 %v2086_v4 }
 0x2d8   :  { %1811 = vmatprep.subr.mxu1 %v2098_v7 }
 0x2d9   :  { %1812 = vmatpush3.msra.mxu1 %v2098_v7 }
 0x2da   :  { %1813 = vmatprep.subr.mxu1 %v2116_v10 }
 0x2db   :  { %1814 = vmatpush3.msra.mxu1 %v2116_v10 }
 0x2dc   :  { %1815 = vmatprep.subr.mxu1 %v2127_v12 }
 0x2dd   :  { %1816 = vmatpush3.msra.mxu1 %v2127_v12 }
 0x2de   :  { %1831 = vmatprep.subr.mxu1 %v2086_v4 }
 0x396   :  { %v1797_v11 = vpop.f32.mrf.mxu1 }
 0x397   :  { %v452_v13 = vadd.f32 %v1797_v11, %v2180_v33 }
 0x398   :  { %v442_v14 = vpop.f32.mrf.mxu1 }
 0x399   :  { %1911 = vtanh.f32 %v452_v13  ;;  %v451_v15 = vadd.f32 %v442_v14, %v2170_v21  ;;  %v1652_v18 = vmul.f32 -1.442695, %v452_v13 }
 0x39b   :  { %1913 = vtanh.f32 %v451_v15  ;;  %v1651_v19 = vmul.f32 -1.442695, %v451_v15 }
 0x39c   :  { %1915 = vpow2.f32 %v1652_v18 }
 0x39d   :  { %1917 = vpow2.f32 %v1651_v19 }
 0x3a6   :  { %v1912_v16 = vpop.eup %1911 }
 0x3a7   :  { %475 = vrot.lane.b32.xlu1 %v1912_v16, %s2024_s3 }
 0x3a8   :  { %v1914_v17 = vpop.eup %1913 }
 0x3a9   :  { %473 = vrot.lane.b32.xlu0 %v1914_v17, %s2024_s3  ;;  %v1916_v20 = vpop.eup %1915 }
 0x3aa   :  { %v1918_v22 = vpop.eup %1917  ;;  %v460_v23 = vadd.f32 1.0, %v1916_v20 }
 0x3ab   :  { %v459_v25 = vadd.f32 1.0, %v1918_v22 }
 0x3ac   :  { %1919 = vrcp.f32 %v460_v23 }
 0x3ad   :  { %1921 = vrcp.f32 %v459_v25 }
 0x3b9   :  { %v1920_v27 = vpop.eup %1919 }
 0x3ba   :  { %v1922_v32 = vpop.eup %1921  ;;  %v470_v39 = vmul.f32 %v1920_v27, %v468_v37 }
 0x3bb   :  { %v469_v43 = vmul.f32 %v1922_v32, %v467_v42 }
 0x419   :  { %v476_v29 = vpop.permute.xlu1 %475 }
 0x41a   :  { %v480_v31 = vmul.f32 %v1920_v27, %v476_v29 }
 0x41b   :  { %v474_v34 = vpop.permute.xlu0 %473 }
 0x41c   :  { %485 = vrot.lane.b32.xlu1 %v480_v31, %s2025_s7  ;;  %v479_v36 = vmul.f32 %v1922_v32, %v474_v34 }
 0x41e   :  { %483 = vrot.lane.b32.xlu0 %v479_v36, %s2025_s7 }
 0x48e   :  { %v486_v40 = vpop.permute.xlu1 %485 }
 0x48f   :  { %v490_v41 = vadd.f32 %v486_v40, %v470_v39 }
 0x490   :  { %v484_v44 = vpop.permute.xlu0 %483 }
 0x491   :  { %1923 = vtanh.f32 %v490_v41  ;;  %504 = vst.msk [vmem:[#allocation5 + $0x8] sm:$0xff] %vm184_vm1, %v490_v41  ;;  %v489_v45 = vadd.f32 %v484_v44, %v469_v43 }
 0x493   :  { %1925 = vtanh.f32 %v489_v45  ;;  %503 = vst.msk [vmem:[#allocation5] sm:$0xff] %vm184_vm1, %v489_v45 }
 0x498   :  { %v626_v15 = vld [vmem:[#allocation5 + $0x8] sm:$0xff] }
 0x49a   :  { %v625_v19 = vld [vmem:[#allocation5] sm:$0xff] }
 0x49e   :  { %v1924_v46 = vpop.eup %1923 }
 0x49f   :  { %497 = vrot.lane.b32.xlu1 %v1924_v46, %s2024_s3 }
 0x4a0   :  { %v1926_v47 = vpop.eup %1925 }
 0x4a1   :  { %495 = vrot.lane.b32.xlu0 %v1926_v47, %s2024_s3 }
 0x511   :  { %v498_v48 = vpop.permute.xlu1 %497 }
 0x512   :  { %v2224_v49 = vmul.f32 %v1920_v27, %v498_v48 }
 0x513   :  { %v496_v50 = vpop.permute.xlu0 %495 }
 0x514   :  { %509 = vrot.lane.b32.xlu1 %v2224_v49, %s2024_s3  ;;  %v501_v51 = vmul.f32 %v1922_v32, %v496_v50 }
 0x516   :  { %507 = vrot.lane.b32.xlu0 %v501_v51, %s2024_s3 }
 0x586   :  { %v510_v52 = vpop.permute.xlu1 %509 }
 0x587   :  { %514 = vst.msk [vmem:[#allocation4 + $0x8] sm:$0xff] %vm184_vm1, %v510_v52 }
 0x588   :  { %v508_v53 = vpop.permute.xlu0 %507 }
 0x589   :  { %513 = vst.msk [vmem:[#allocation4] sm:$0xff] %vm184_vm1, %v508_v53  ;;  %515 = vst.msk [vmem:[#allocation3 + $0x8] sm:$0xff] %vm184_vm1, %v508_v53 }
 0x58e   :  { %v523_v55 = vld [vmem:[#allocation4 + $0x8] sm:$0xff] }
 0x590   :  { %v522_v54 = vld [vmem:[#allocation4] sm:$0xff] }
 0x591   :  { %1806 = vmatprep.mubr.msk.f32.mxu0 %vm184_vm1, %v522_v54 }
 0x592   :  { %1807 = vmatmul.mubr.msk.f32.vlgmr.msra.gmra.mxu0 %vm184_vm1, %v523_v55 }
 0x593   :  { %1821 = vmatpush3.msra.mxu0 %v2086_v4 }
 0x594   :  { %1822 = vmatprep.subr.mxu0 %v2098_v7 }
 0x595   :  { %1823 = vmatpush3.msra.mxu0 %v2098_v7 }
 0x596   :  { %1824 = vmatprep.subr.mxu0 %v2116_v10 }
 0x597   :  { %1825 = vmatpush3.msra.mxu0 %v2116_v10 }
 0x598   :  { %1826 = vmatprep.subr.mxu0 %v2127_v12 }
 0x599   :  { %1827 = vmatpush3.msra.mxu0 %v2127_v12 }
 0x59a   :  { %1842 = vmatprep.subr.mxu0 %v2086_v4 }
 0x652   :  { %v1808_v56 = vpop.f32.mrf.mxu0 }
 0x653   :  { %v610_v57 = vadd.f32 %v1808_v56, %v2176_v28 }
 0x654   :  { %v600_v58 = vpop.f32.mrf.mxu0 }
 0x655   :  { %1927 = vtanh.f32 %v610_v57  ;;  %v609_v59 = vadd.f32 %v600_v58, %v2174_v26  ;;  %v1656_v62 = vmul.f32 -1.442695, %v610_v57 }
 0x657   :  { %1929 = vtanh.f32 %v609_v59  ;;  %v1655_v63 = vmul.f32 -1.442695, %v609_v59 }
 0x658   :  { %1931 = vpow2.f32 %v1656_v62 }
 0x659   :  { %1933 = vpow2.f32 %v1655_v63 }
 0x662   :  { %v1928_v60 = vpop.eup %1927 }
 0x663   :  { %633 = vrot.lane.b32.xlu1 %v1928_v60, %s2024_s3 }
 0x664   :  { %v1930_v61 = vpop.eup %1929 }
 0x665   :  { %631 = vrot.lane.b32.xlu0 %v1930_v61, %s2024_s3  ;;  %v1932_v0 = vpop.eup %1931 }
 0x666   :  { %v1934_v1 = vpop.eup %1933  ;;  %v618_v2 = vadd.f32 1.0, %v1932_v0 }
 0x667   :  { %v617_v5 = vadd.f32 1.0, %v1934_v1 }
 0x668   :  { %1935 = vrcp.f32 %v618_v2 }
 0x669   :  { %1937 = vrcp.f32 %v617_v5 }
 0x675   :  { %v1936_v6 = vpop.eup %1935 }
 0x676   :  { %v1938_v11 = vpop.eup %1937  ;;  %v628_v16 = vmul.f32 %v1936_v6, %v626_v15 }
 0x677   :  { %v627_v20 = vmul.f32 %v1938_v11, %v625_v19 }
 0x6d5   :  { %v634_v8 = vpop.permute.xlu1 %633 }
 0x6d6   :  { %v638_v9 = vmul.f32 %v1936_v6, %v634_v8 }
 0x6d7   :  { %v632_v13 = vpop.permute.xlu0 %631 }
 0x6d8   :  { %643 = vrot.lane.b32.xlu1 %v638_v9, %s2025_s7  ;;  %v637_v14 = vmul.f32 %v1938_v11, %v632_v13 }
 0x6da   :  { %641 = vrot.lane.b32.xlu0 %v637_v14, %s2025_s7 }
 0x74a   :  { %v644_v17 = vpop.permute.xlu1 %643 }
 0x74b   :  { %v648_v18 = vadd.f32 %v644_v17, %v628_v16 }
 0x74c   :  { %v642_v22 = vpop.permute.xlu0 %641 }
 0x74d   :  { %1939 = vtanh.f32 %v648_v18  ;;  %662 = vst.msk [vmem:[#allocation5 + $0x8] sm:$0xff] %vm184_vm1, %v648_v18  ;;  %v647_v23 = vadd.f32 %v642_v22, %v627_v20 }
 0x74f   :  { %1941 = vtanh.f32 %v647_v23  ;;  %661 = vst.msk [vmem:[#allocation5] sm:$0xff] %vm184_vm1, %v647_v23 }
 0x754   :  { %v784_v60 = vld [vmem:[#allocation5 + $0x8] sm:$0xff] }
 0x756   :  { %v783_v0 = vld [vmem:[#allocation5] sm:$0xff] }
 0x75a   :  { %v1940_v25 = vpop.eup %1939 }
 0x75b   :  { %655 = vrot.lane.b32.xlu1 %v1940_v25, %s2024_s3 }
 0x75c   :  { %v1942_v27 = vpop.eup %1941 }
 0x75d   :  { %653 = vrot.lane.b32.xlu0 %v1942_v27, %s2024_s3 }
 0x7cd   :  { %v656_v29 = vpop.permute.xlu1 %655 }
 0x7ce   :  { %v2252_v31 = vmul.f32 %v1936_v6, %v656_v29 }
 0x7cf   :  { %v654_v32 = vpop.permute.xlu0 %653 }
 0x7d0   :  { %667 = vrot.lane.b32.xlu1 %v2252_v31, %s2024_s3  ;;  %v659_v34 = vmul.f32 %v1938_v11, %v654_v32 }
 0x7d2   :  { %665 = vrot.lane.b32.xlu0 %v659_v34, %s2024_s3 }
 0x842   :  { %v668_v36 = vpop.permute.xlu1 %667 }
 0x843   :  { %672 = vst.msk [vmem:[#allocation4 + $0x8] sm:$0xff] %vm184_vm1, %v668_v36 }
 0x844   :  { %v666_v37 = vpop.permute.xlu0 %665 }
 0x845   :  { %671 = vst.msk [vmem:[#allocation4] sm:$0xff] %vm184_vm1, %v666_v37  ;;  %673 = vst.msk [vmem:[#allocation3 + $0x10] sm:$0xff] %vm184_vm1, %v666_v37 }
 0x84a   :  { %v681_v40 = vld [vmem:[#allocation4 + $0x8] sm:$0xff] }
 0x84c   :  { %v680_v39 = vld [vmem:[#allocation4] sm:$0xff] }
 0x84d   :  { %1817 = vmatprep.mubr.msk.f32.mxu1 %vm184_vm1, %v680_v39 }
 0x84e   :  { %1818 = vmatmul.mubr.msk.f32.vlgmr.msra.gmra.mxu1 %vm184_vm1, %v681_v40 }
 0x84f   :  { %1832 = vmatpush3.msra.mxu1 %v2086_v4 }
 0x850   :  { %1833 = vmatprep.subr.mxu1 %v2098_v7 }
 0x851   :  { %1834 = vmatpush3.msra.mxu1 %v2098_v7 }
 0x852   :  { %1835 = vmatprep.subr.mxu1 %v2116_v10 }
 0x853   :  { %1836 = vmatpush3.msra.mxu1 %v2116_v10 }
 0x854   :  { %1837 = vmatprep.subr.mxu1 %v2127_v12 }
 0x855   :  { %1838 = vmatpush3.msra.mxu1 %v2127_v12 }
 0x856   :  { %1853 = vmatprep.subr.mxu1 %v2086_v4 }
 0x90e   :  { %v1819_v41 = vpop.f32.mrf.mxu1 }
 0x90f   :  { %v768_v42 = vadd.f32 %v1819_v41, %v2178_v30 }
 0x910   :  { %v758_v43 = vpop.f32.mrf.mxu1 }
 0x911   :  { %1943 = vtanh.f32 %v768_v42  ;;  %v767_v44 = vadd.f32 %v758_v43, %v2172_v24  ;;  %v1660_v47 = vmul.f32 -1.442695, %v768_v42 }
 0x913   :  { %1945 = vtanh.f32 %v767_v44  ;;  %v1659_v48 = vmul.f32 -1.442695, %v767_v44 }
 0x914   :  { %1947 = vpow2.f32 %v1660_v47 }
 0x915   :  { %1949 = vpow2.f32 %v1659_v48 }
 0x91e   :  { %v1944_v45 = vpop.eup %1943 }
 0x91f   :  { %791 = vrot.lane.b32.xlu1 %v1944_v45, %s2024_s3 }
 0x920   :  { %v1946_v46 = vpop.eup %1945 }
 0x921   :  { %789 = vrot.lane.b32.xlu0 %v1946_v46, %s2024_s3  ;;  %v1948_v50 = vpop.eup %1947 }
 0x922   :  { %v1950_v51 = vpop.eup %1949  ;;  %v776_v52 = vadd.f32 1.0, %v1948_v50 }
 0x923   :  { %v775_v53 = vadd.f32 1.0, %v1950_v51 }
 0x924   :  { %1951 = vrcp.f32 %v776_v52 }
 0x925   :  { %1953 = vrcp.f32 %v775_v53 }
 0x931   :  { %v1952_v54 = vpop.eup %1951 }
 0x932   :  { %v1954_v57 = vpop.eup %1953  ;;  %v786_v61 = vmul.f32 %v1952_v54, %v784_v60 }
 0x933   :  { %v785_v1 = vmul.f32 %v1954_v57, %v783_v0 }
 0x991   :  { %v792_v55 = vpop.permute.xlu1 %791 }
 0x992   :  { %v796_v56 = vmul.f32 %v1952_v54, %v792_v55 }
 0x993   :  { %v790_v58 = vpop.permute.xlu0 %789 }
 0x994   :  { %801 = vrot.lane.b32.xlu1 %v796_v56, %s2025_s7  ;;  %v795_v59 = vmul.f32 %v1954_v57, %v790_v58 }
 0x996   :  { %799 = vrot.lane.b32.xlu0 %v795_v59, %s2025_s7 }
 0xa06   :  { %v802_v62 = vpop.permute.xlu1 %801 }
 0xa07   :  { %v806_v63 = vadd.f32 %v802_v62, %v786_v61 }
 0xa08   :  { %v800_v2 = vpop.permute.xlu0 %799 }
 0xa09   :  { %1955 = vtanh.f32 %v806_v63  ;;  %820 = vst.msk [vmem:[#allocation5 + $0x8] sm:$0xff] %vm184_vm1, %v806_v63  ;;  %v805_v5 = vadd.f32 %v800_v2, %v785_v1 }
 0xa0b   :  { %1957 = vtanh.f32 %v805_v5  ;;  %819 = vst.msk [vmem:[#allocation5] sm:$0xff] %vm184_vm1, %v805_v5 }
 0xa10   :  { %v942_v44 = vld [vmem:[#allocation5 + $0x8] sm:$0xff] }
 0xa12   :  { %v941_v48 = vld [vmem:[#allocation5] sm:$0xff] }
 0xa16   :  { %v1956_v6 = vpop.eup %1955 }
 0xa17   :  { %813 = vrot.lane.b32.xlu1 %v1956_v6, %s2024_s3 }
 0xa18   :  { %v1958_v8 = vpop.eup %1957 }
 0xa19   :  { %811 = vrot.lane.b32.xlu0 %v1958_v8, %s2024_s3 }
 0xa89   :  { %v814_v9 = vpop.permute.xlu1 %813 }
 0xa8a   :  { %v2280_v11 = vmul.f32 %v1952_v54, %v814_v9 }
 0xa8b   :  { %v812_v13 = vpop.permute.xlu0 %811 }
 0xa8c   :  { %825 = vrot.lane.b32.xlu1 %v2280_v11, %s2024_s3  ;;  %v817_v14 = vmul.f32 %v1954_v57, %v812_v13 }
 0xa8e   :  { %823 = vrot.lane.b32.xlu0 %v817_v14, %s2024_s3 }
 0xafe   :  { %v826_v15 = vpop.permute.xlu1 %825 }
 0xaff   :  { %830 = vst.msk [vmem:[#allocation4 + $0x8] sm:$0xff] %vm184_vm1, %v826_v15 }
 0xb00   :  { %v824_v16 = vpop.permute.xlu0 %823 }
 0xb01   :  { %829 = vst.msk [vmem:[#allocation4] sm:$0xff] %vm184_vm1, %v824_v16  ;;  %831 = vst.msk [vmem:[#allocation3 + $0x18] sm:$0xff] %vm184_vm1, %v824_v16 }
 0xb06   :  { %v839_v18 = vld [vmem:[#allocation4 + $0x8] sm:$0xff] }
 0xb08   :  { %v838_v17 = vld [vmem:[#allocation4] sm:$0xff] }
 0xb09   :  { %1828 = vmatprep.mubr.msk.f32.mxu0 %vm184_vm1, %v838_v17 }
 0xb0a   :  { %1829 = vmatmul.mubr.msk.f32.vlgmr.msra.gmra.mxu0 %vm184_vm1, %v839_v18 }
 0xb0b   :  { %1843 = vmatpush3.msra.mxu0 %v2086_v4 }
 0xb0c   :  { %1844 = vmatprep.subr.mxu0 %v2098_v7 }
 0xb0d   :  { %1845 = vmatpush3.msra.mxu0 %v2098_v7 }
 0xb0e   :  { %1846 = vmatprep.subr.mxu0 %v2116_v10 }
 0xb0f   :  { %1847 = vmatpush3.msra.mxu0 %v2116_v10 }
 0xb10   :  { %1848 = vmatprep.subr.mxu0 %v2127_v12 }
 0xb11   :  { %1849 = vmatpush3.msra.mxu0 %v2127_v12 }
 0xbca   :  { %v1830_v19 = vpop.f32.mrf.mxu0 }
 0xbcb   :  { %v926_v20 = vadd.f32 %v1830_v19, %v2172_v24 }
 0xbcc   :  { %v916_v22 = vpop.f32.mrf.mxu0 }
 0xbcd   :  { %1959 = vtanh.f32 %v926_v20  ;;  %v925_v23 = vadd.f32 %v916_v22, %v2178_v30  ;;  %v1664_v29 = vmul.f32 -1.442695, %v926_v20 }
 0xbcf   :  { %1961 = vtanh.f32 %v925_v23  ;;  %v1663_v32 = vmul.f32 -1.442695, %v925_v23 }
 0xbd0   :  { %1963 = vpow2.f32 %v1664_v29 }
 0xbd1   :  { %1965 = vpow2.f32 %v1663_v32 }
 0xbda   :  { %v1960_v25 = vpop.eup %1959 }
 0xbdb   :  { %949 = vrot.lane.b32.xlu1 %v1960_v25, %s2024_s3 }
 0xbdc   :  { %v1962_v27 = vpop.eup %1961 }
 0xbdd   :  { %947 = vrot.lane.b32.xlu0 %v1962_v27, %s2024_s3  ;;  %v1964_v34 = vpop.eup %1963 }
 0xbde   :  { %v1966_v36 = vpop.eup %1965  ;;  %v934_v37 = vadd.f32 1.0, %v1964_v34 }
 0xbdf   :  { %v933_v39 = vadd.f32 1.0, %v1966_v36 }
 0xbe0   :  { %1967 = vrcp.f32 %v934_v37 }
 0xbe1   :  { %1969 = vrcp.f32 %v933_v39 }
 0xbed   :  { %v1968_v24 = vpop.eup %1967 }
 0xbee   :  { %v1970_v41 = vpop.eup %1969  ;;  %v944_v45 = vmul.f32 %v1968_v24, %v942_v44 }
 0xbef   :  { %v943_v50 = vmul.f32 %v1970_v41, %v941_v48 }
 0xc4d   :  { %v950_v40 = vpop.permute.xlu1 %949 }
 0xc4e   :  { %v954_v30 = vmul.f32 %v1968_v24, %v950_v40 }
 0xc4f   :  { %v948_v42 = vpop.permute.xlu0 %947 }
 0xc50   :  { %959 = vrot.lane.b32.xlu1 %v954_v30, %s2025_s7  ;;  %v953_v43 = vmul.f32 %v1970_v41, %v948_v42 }
 0xc52   :  { %957 = vrot.lane.b32.xlu0 %v953_v43, %s2025_s7 }
 0xcc2   :  { %v960_v46 = vpop.permute.xlu1 %959 }
 0xcc3   :  { %v964_v47 = vadd.f32 %v960_v46, %v944_v45 }
 0xcc4   :  { %v958_v51 = vpop.permute.xlu0 %957 }
 0xcc5   :  { %1971 = vtanh.f32 %v964_v47  ;;  %978 = vst.msk [vmem:[#allocation5 + $0x8] sm:$0xff] %vm184_vm1, %v964_v47  ;;  %v963_v52 = vadd.f32 %v958_v51, %v943_v50 }
 0xcc7   :  { %1973 = vtanh.f32 %v963_v52  ;;  %977 = vst.msk [vmem:[#allocation5] sm:$0xff] %vm184_vm1, %v963_v52 }
 0xccc   :  { %v1100_v17 = vld [vmem:[#allocation5 + $0x8] sm:$0xff] }
 0xcce   :  { %v1099_v22 = vld [vmem:[#allocation5] sm:$0xff] }
 0xcd2   :  { %v1972_v53 = vpop.eup %1971 }
 0xcd3   :  { %971 = vrot.lane.b32.xlu1 %v1972_v53, %s2024_s3 }
 0xcd4   :  { %v1974_v54 = vpop.eup %1973 }
 0xcd5   :  { %969 = vrot.lane.b32.xlu0 %v1974_v54, %s2024_s3 }
 0xd45   :  { %v972_v55 = vpop.permute.xlu1 %971 }
 0xd46   :  { %v2307_v56 = vmul.f32 %v1968_v24, %v972_v55 }
 0xd47   :  { %v970_v57 = vpop.permute.xlu0 %969 }
 0xd48   :  { %983 = vrot.lane.b32.xlu1 %v2307_v56, %s2024_s3  ;;  %v975_v58 = vmul.f32 %v1970_v41, %v970_v57 }
 0xd4a   :  { %981 = vrot.lane.b32.xlu0 %v975_v58, %s2024_s3 }
 0xdba   :  { %v984_v59 = vpop.permute.xlu1 %983 }
 0xdbb   :  { %988 = vst.msk [vmem:[#allocation4 + $0x8] sm:$0xff] %vm184_vm1, %v984_v59 }
 0xdbc   :  { %v2313_v60 = vpop.permute.xlu0 %981 }
 0xdbd   :  { %987 = vst.msk [vmem:[#allocation4] sm:$0xff] %vm184_vm1, %v2313_v60 }
 0xdc2   :  { %v997_v62 = vld [vmem:[#allocation4 + $0x8] sm:$0xff] }
 0xdc4   :  { %v996_v61 = vld [vmem:[#allocation4] sm:$0xff] }
 0xdc5   :  { %1839 = vmatprep.mubr.msk.f32.mxu1 %vm184_vm1, %v996_v61 }
 0xdc6   :  { %1840 = vmatmul.mubr.msk.f32.vlgmr.msra.gmra.mxu1 %vm184_vm1, %v997_v62 }
 0xdc7   :  { %1854 = vmatpush3.msra.mxu1 %v2086_v4 }
 0xdc8   :  { %1855 = vmatprep.subr.mxu1 %v2098_v7 }
 0xdc9   :  { %1856 = vmatpush3.msra.mxu1 %v2098_v7 }
 0xdca   :  { %1857 = vmatprep.subr.mxu1 %v2116_v10 }
 0xdcb   :  { %1858 = vmatpush3.msra.mxu1 %v2116_v10 }
 0xdcc   :  { %1859 = vmatprep.subr.mxu1 %v2127_v12 }
 0xdcd   :  { %1860 = vmatpush3.msra.mxu1 %v2127_v12 }
 0xe86   :  { %v1841_v63 = vpop.f32.mrf.mxu1 }
 0xe87   :  { %v1084_v0 = vadd.f32 %v1841_v63, %v2174_v26 }
 0xe88   :  { %v1074_v1 = vpop.f32.mrf.mxu1 }
 0xe89   :  { %1975 = vtanh.f32 %v1084_v0  ;;  %v1083_v2 = vadd.f32 %v1074_v1, %v2176_v28  ;;  %v1668_v5 = vmul.f32 -1.442695, %v1084_v0 }
 0xe8b   :  { %1977 = vtanh.f32 %v1083_v2  ;;  %v1667_v10 = vmul.f32 -1.442695, %v1083_v2 }
 0xe8c   :  { %1979 = vpow2.f32 %v1668_v5 }
 0xe8d   :  { %1981 = vpow2.f32 %v1667_v10 }
 0xe96   :  { %v1976_v4 = vpop.eup %1975 }
 0xe97   :  { %1107 = vrot.lane.b32.xlu1 %v1976_v4, %s2024_s3 }
 0xe98   :  { %v1978_v7 = vpop.eup %1977 }
 0xe99   :  { %1105 = vrot.lane.b32.xlu0 %v1978_v7, %s2024_s3  ;;  %v1980_v6 = vpop.eup %1979 }
 0xe9a   :  { %v1982_v12 = vpop.eup %1981  ;;  %v1092_v8 = vadd.f32 1.0, %v1980_v6 }
 0xe9b   :  { %v1091_v9 = vadd.f32 1.0, %v1982_v12 }
 0xe9c   :  { %1983 = vrcp.f32 %v1092_v8 }
 0xe9d   :  { %1985 = vrcp.f32 %v1091_v9 }
 0xea9   :  { %v1984_v26 = vpop.eup %1983 }
 0xeaa   :  { %v1986_v14 = vpop.eup %1985  ;;  %v1102_v18 = vmul.f32 %v1984_v26, %v1100_v17 }
 0xeab   :  { %v1101_v23 = vmul.f32 %v1986_v14, %v1099_v22 }
 0xf09   :  { %v1108_v13 = vpop.permute.xlu1 %1107 }
 0xf0a   :  { %v1112_v28 = vmul.f32 %v1984_v26, %v1108_v13 }
 0xf0b   :  { %v1106_v15 = vpop.permute.xlu0 %1105 }
 0xf0c   :  { %1117 = vrot.lane.b32.xlu1 %v1112_v28, %s2025_s7  ;;  %v1111_v16 = vmul.f32 %v1986_v14, %v1106_v15 }
 0xf0e   :  { %1115 = vrot.lane.b32.xlu0 %v1111_v16, %s2025_s7 }
 0xf7e   :  { %v1118_v19 = vpop.permute.xlu1 %1117 }
 0xf7f   :  { %v1122_v20 = vadd.f32 %v1118_v19, %v1102_v18 }
 0xf80   :  { %v1116_v25 = vpop.permute.xlu0 %1115 }
 0xf81   :  { %1987 = vtanh.f32 %v1122_v20  ;;  %1136 = vst.msk [vmem:[#allocation5 + $0x8] sm:$0xff] %vm184_vm1, %v1122_v20  ;;  %v1121_v27 = vadd.f32 %v1116_v25, %v1101_v23 }
 0xf83   :  { %1989 = vtanh.f32 %v1121_v27  ;;  %1135 = vst.msk [vmem:[#allocation5] sm:$0xff] %vm184_vm1, %v1121_v27 }
 0xf88   :  { %v1258_v61 = vld [vmem:[#allocation5 + $0x8] sm:$0xff] }
 0xf8a   :  { %v1257_v1 = vld [vmem:[#allocation5] sm:$0xff] }
 0xf8e   :  { %v1988_v29 = vpop.eup %1987 }
 0xf8f   :  { %1129 = vrot.lane.b32.xlu1 %v1988_v29, %s2024_s3 }
 0xf90   :  { %v1990_v32 = vpop.eup %1989 }
 0xf91   :  { %1127 = vrot.lane.b32.xlu0 %v1990_v32, %s2024_s3 }
0x1001   :  { %v1130_v34 = vpop.permute.xlu1 %1129 }
0x1002   :  { %v2336_v36 = vmul.f32 %v1984_v26, %v1130_v34 }
0x1003   :  { %v1128_v37 = vpop.permute.xlu0 %1127 }
0x1004   :  { %1141 = vrot.lane.b32.xlu1 %v2336_v36, %s2024_s3  ;;  %v1133_v39 = vmul.f32 %v1986_v14, %v1128_v37 }
0x1006   :  { %1139 = vrot.lane.b32.xlu0 %v1133_v39, %s2024_s3 }
0x1076   :  { %v1142_v24 = vpop.permute.xlu1 %1141 }
0x1077   :  { %1146 = vst.msk [vmem:[#allocation4 + $0x8] sm:$0xff] %vm184_vm1, %v1142_v24 }
0x1078   :  { %v2342_v40 = vpop.permute.xlu0 %1139 }
0x1079   :  { %1145 = vst.msk [vmem:[#allocation4] sm:$0xff] %vm184_vm1, %v2342_v40 }
0x107e   :  { %v1155_v41 = vld [vmem:[#allocation4 + $0x8] sm:$0xff] }
0x1080   :  { %v1154_v30 = vld [vmem:[#allocation4] sm:$0xff] }
0x1081   :  { %1850 = vmatprep.mubr.msk.f32.mxu0 %vm184_vm1, %v1154_v30 }
0x1082   :  { %1851 = vmatmul.mubr.msk.f32.vlgmr.msra.gmra.mxu0 %vm184_vm1, %v1155_v41 }
0x1142   :  { %v1852_v42 = vpop.f32.mrf.mxu0 }
0x1143   :  { %v1242_v43 = vadd.f32 %v1852_v42, %v2170_v21 }
0x1144   :  { %v1232_v44 = vpop.f32.mrf.mxu0 }
0x1145   :  { %1991 = vtanh.f32 %v1242_v43  ;;  %v1241_v45 = vadd.f32 %v1232_v44, %v2180_v33  ;;  %v1672_v48 = vmul.f32 -1.442695, %v1242_v43 }
0x1147   :  { %1993 = vtanh.f32 %v1241_v45  ;;  %v1671_v50 = vmul.f32 -1.442695, %v1241_v45 }
0x1148   :  { %1995 = vpow2.f32 %v1672_v48 }
0x1149   :  { %1997 = vpow2.f32 %v1671_v50 }
0x1152   :  { %v1992_v46 = vpop.eup %1991 }
0x1153   :  { %1265 = vrot.lane.b32.xlu1 %v1992_v46, %s2024_s3 }
0x1154   :  { %v1994_v47 = vpop.eup %1993 }
0x1155   :  { %1263 = vrot.lane.b32.xlu0 %v1994_v47, %s2024_s3  ;;  %v1996_v51 = vpop.eup %1995 }
0x1156   :  { %v1998_v52 = vpop.eup %1997  ;;  %v1250_v53 = vadd.f32 1.0, %v1996_v51  ;;  %v1483_v51 = vld [vmem:[%s2488_s4 + $0x38] sm:$0xff] }
0x1157   :  { %v1249_v54 = vadd.f32 1.0, %v1998_v52  ;;  %v1482_v52 = vld [vmem:[%s2488_s4 + $0x30] sm:$0xff]  ;;  %1864 = vmatprep.subr.mxu0 %v1483_v51 }
0x1158   :  { %1999 = vrcp.f32 %v1250_v53  ;;  %1865 = vmatpush3.msra.mxu0 %v1483_v51  ;;  %v1481_v53 = vld [vmem:[%s2488_s4 + $0x28] sm:$0xff] }
0x1159   :  { %2001 = vrcp.f32 %v1249_v54  ;;  %1866 = vmatprep.subr.mxu0 %v1482_v52  ;;  %v1480_v54 = vld [vmem:[%s2488_s4 + $0x20] sm:$0xff] }
0x115a   :  { %1867 = vmatpush3.msra.mxu0 %v1482_v52 }
0x115b   :  { %1868 = vmatprep.subr.mxu0 %v1481_v53 }
0x115c   :  { %1869 = vmatpush3.msra.mxu0 %v1481_v53 }
0x115d   :  { %1870 = vmatprep.subr.mxu0 %v1480_v54 }
0x115e   :  { %1871 = vmatpush3.msra.mxu0 %v1480_v54 }
0x1165   :  { %v2000_v21 = vpop.eup %1999 }
0x1166   :  { %v2002_v57 = vpop.eup %2001  ;;  %v1260_v62 = vmul.f32 %v2000_v21, %v1258_v61 }
0x1167   :  { %v1259_v2 = vmul.f32 %v2002_v57, %v1257_v1 }
0x11c5   :  { %v1266_v55 = vpop.permute.xlu1 %1265 }
0x11c6   :  { %v1270_v33 = vmul.f32 %v2000_v21, %v1266_v55 }
0x11c7   :  { %v1264_v58 = vpop.permute.xlu0 %1263 }
0x11c8   :  { %1275 = vrot.lane.b32.xlu1 %v1270_v33, %s2025_s7  ;;  %v1269_v59 = vmul.f32 %v2002_v57, %v1264_v58 }
0x11ca   :  { %1273 = vrot.lane.b32.xlu0 %v1269_v59, %s2025_s7 }
0x123a   :  { %v1276_v63 = vpop.permute.xlu1 %1275 }
0x123b   :  { %v1280_v0 = vadd.f32 %v1276_v63, %v1260_v62 }
0x123c   :  { %v1274_v4 = vpop.permute.xlu0 %1273 }
0x123d   :  { %2003 = vtanh.f32 %v1280_v0  ;;  %1294 = vst.msk [vmem:[#allocation5 + $0x8] sm:$0xff] %vm184_vm1, %v1280_v0  ;;  %v1279_v7 = vadd.f32 %v1274_v4, %v1259_v2 }
0x123f   :  { %2005 = vtanh.f32 %v1279_v7  ;;  %1293 = vst.msk [vmem:[#allocation5] sm:$0xff] %vm184_vm1, %v1279_v7 }
0x1244   :  { %v1416_v30 = vld [vmem:[#allocation5 + $0x8] sm:$0xff] }
0x1246   :  { %v1415_v44 = vld [vmem:[#allocation5] sm:$0xff] }
0x124a   :  { %v2004_v5 = vpop.eup %2003 }
0x124b   :  { %1287 = vrot.lane.b32.xlu1 %v2004_v5, %s2024_s3 }
0x124c   :  { %v2006_v10 = vpop.eup %2005 }
0x124d   :  { %1285 = vrot.lane.b32.xlu0 %v2006_v10, %s2024_s3 }
0x12bd   :  { %v1288_v6 = vpop.permute.xlu1 %1287 }
0x12be   :  { %v1292_v12 = vmul.f32 %v2000_v21, %v1288_v6  ;;  %v1479_v21 = vld [vmem:[%s2488_s4 + $0x18] sm:$0xff] }
0x12bf   :  { %v1286_v8 = vpop.permute.xlu0 %1285  ;;  %1872 = vmatprep.subr.mxu0 %v1479_v21 }
0x12c0   :  { %1299 = vrot.lane.b32.xlu1 %v1292_v12, %s2024_s3  ;;  %v1291_v9 = vmul.f32 %v2002_v57, %v1286_v8  ;;  %1873 = vmatpush3.msra.mxu0 %v1479_v21  ;;  %v1677_v8 = vld [vmem:[%s2489_s5] ss:$0 sm:$0xff] }
0x12c2   :  { %1297 = vrot.lane.b32.xlu0 %v1291_v9, %s2024_s3 }
0x1332   :  { %v1300_v26 = vpop.permute.xlu1 %1299 }
0x1333   :  { %1304 = vst.msk [vmem:[#allocation4 + $0x8] sm:$0xff] %vm184_vm1, %v1300_v26 }
0x1334   :  { %v2361_v13 = vpop.permute.xlu0 %1297 }
0x1335   :  { %1303 = vst.msk [vmem:[#allocation4] sm:$0xff] %vm184_vm1, %v2361_v13 }
0x133a   :  { %v1313_v14 = vld [vmem:[#allocation4 + $0x8] sm:$0xff] }
0x133c   :  { %v1312_v28 = vld [vmem:[#allocation4] sm:$0xff] }
0x133d   :  { %1861 = vmatprep.mubr.msk.f32.mxu1 %vm184_vm1, %v1312_v28 }
0x133e   :  { %1862 = vmatmul.mubr.msk.f32.vlgmr.msra.gmra.mxu1 %vm184_vm1, %v1313_v14 }
0x13fe   :  { %v1863_v15 = vpop.f32.mrf.mxu1 }
0x13ff   :  { %v1400_v16 = vadd.f32 %v1863_v15, %v2182_v35 }
0x1400   :  { %v1390_v17 = vpop.f32.mrf.mxu1 }
0x1401   :  { %2007 = vtanh.f32 %v1400_v16  ;;  %v1399_v18 = vadd.f32 %v1390_v17, %v2185_v38  ;;  %v1676_v22 = vmul.f32 -1.442695, %v1400_v16 }
0x1403   :  { %2009 = vtanh.f32 %v1399_v18  ;;  %v1675_v23 = vmul.f32 -1.442695, %v1399_v18 }
0x1404   :  { %2011 = vpow2.f32 %v1676_v22 }
0x1405   :  { %2013 = vpow2.f32 %v1675_v23 }
0x140e   :  { %v2008_v19 = vpop.eup %2007 }
0x140f   :  { %1423 = vrot.lane.b32.xlu0 %v2008_v19, %s2024_s3 }
0x1410   :  { %v2010_v20 = vpop.eup %2009 }
0x1411   :  { %1421 = vrot.lane.b32.xlu1 %v2010_v20, %s2024_s3  ;;  %v2012_v25 = vpop.eup %2011 }
0x1412   :  { %v2014_v27 = vpop.eup %2013  ;;  %v1408_v29 = vadd.f32 1.0, %v2012_v25 }
0x1413   :  { %v1407_v32 = vadd.f32 1.0, %v2014_v27 }
0x1414   :  { %2015 = vrcp.f32 %v1408_v29 }
0x1415   :  { %2017 = vrcp.f32 %v1407_v32 }
0x1421   :  { %v2016_v35 = vpop.eup %2015 }
0x1422   :  { %v2371_v37 = vpop.eup %2017  ;;  %v1418_v41 = vmul.f32 %v2016_v35, %v1416_v30 }
0x1423   :  { %v1417_v45 = vmul.f32 %v2371_v37, %v1415_v44 }
0x1481   :  { %v1424_v34 = vpop.permute.xlu0 %1423 }
0x1482   :  { %v1428_v38 = vmul.f32 %v2016_v35, %v1424_v34 }
0x1483   :  { %v1422_v39 = vpop.permute.xlu1 %1421 }
0x1484   :  { %1433 = vrot.lane.b32.xlu0 %v1428_v38, %s2025_s7  ;;  %v1427_v24 = vmul.f32 %v2371_v37, %v1422_v39 }
0x1486   :  { %1431 = vrot.lane.b32.xlu1 %v1427_v24, %s2025_s7 }
0x14f6   :  { %v1434_v42 = vpop.permute.xlu0 %1433 }
0x14f7   :  { %v1438_v43 = vadd.f32 %v1434_v42, %v1418_v41 }
0x14f8   :  { %v1432_v46 = vpop.permute.xlu1 %1431 }
0x14f9   :  { %2019 = vtanh.f32 %v1438_v43  ;;  %1452 = vst.msk [vmem:[#allocation5 + $0x8] sm:$0xff] %vm184_vm1, %v1438_v43  ;;  %v1437_v47 = vadd.f32 %v1432_v46, %v1417_v45 }
0x14fb   :  { %2021 = vtanh.f32 %v1437_v47  ;;  %1451 = vst.msk [vmem:[#allocation5] sm:$0xff] %vm184_vm1, %v1437_v47 }
0x1506   :  { %v2020_v48 = vpop.eup %2019 }
0x1507   :  { %1445 = vrot.lane.b32.xlu0 %v2020_v48, %s2024_s3 }
0x1508   :  { %v2022_v50 = vpop.eup %2021 }
0x1509   :  { %1443 = vrot.lane.b32.xlu1 %v2022_v50, %s2024_s3 }
0x150d   :  { %1306 = vrot.lane.b32.xlu1 %v1292_v12, %s2025_s7 }
0x1511   :  { %990 = vrot.lane.b32.xlu1 %v2307_v56, %s2025_s7  ;;  %v1478_v56 = vld [vmem:[%s2488_s4 + $0x10] sm:$0xff] }
0x1512   :  { %1874 = vmatprep.subr.mxu0 %v1478_v56 }
0x1513   :  { %1875 = vmatpush3.msra.mxu0 %v1478_v56 }
0x1515   :  { %674 = vrot.lane.b32.xlu1 %v2252_v31, %s2025_s7  ;;  %v1477_v31 = vld [vmem:[%s2488_s4 + $0x8] sm:$0xff] }
0x1516   :  { %1876 = vmatprep.subr.mxu0 %v1477_v31 }
0x1517   :  { %1877 = vmatpush3.msra.mxu0 %v1477_v31 }
0x1519   :  { %357 = vrot.lane.b32.xlu1 %v2197_v3, %s2025_s7  ;;  %v1476_v3 = vld [vmem:[%s2488_s4] sm:$0xff] }
0x151a   :  { %1878 = vmatprep.subr.mxu0 %v1476_v3 }
0x151b   :  { %1879 = vmatpush3.msra.mxu0 %v1476_v3 }
0x1579   :  { %v1446_v55 = vpop.permute.xlu0 %1445 }
0x157a   :  { %v1450_v33 = vmul.f32 %v2016_v35, %v1446_v55 }
0x157b   :  { %v1444_v57 = vpop.permute.xlu1 %1443 }
0x157c   :  { %1464 = vrot.lane.b32.xlu0 %v1450_v33, %s2025_s7  ;;  %1457 = vrot.lane.b32.xlu1 %v1450_v33, %s2024_s3  ;;  %v1449_v62 = vmul.f32 %v2371_v37, %v1444_v57 }
0x157f   :  { %v1307_v58 = vpop.permute.xlu1 %1306 }
0x1580   :  { %1148 = vrot.lane.b32.xlu0 %v2336_v36, %s2025_s7  ;;  %1309 = vst.msk [vmem:[#allocation3 + $0x8] sm:$0xff] %vm360_vm2, %v1307_v58 }
0x1583   :  { %v991_v59 = vpop.permute.xlu1 %990 }
0x1584   :  { %832 = vrot.lane.b32.xlu0 %v2280_v11, %s2025_s7  ;;  %993 = vst.msk [vmem:[#allocation3 + $0x18] sm:$0xff] %vm360_vm2, %v991_v59 }
0x1587   :  { %v675_v61 = vpop.permute.xlu1 %674 }
0x1588   :  { %516 = vrot.lane.b32.xlu0 %v2224_v49, %s2025_s7  ;;  %677 = vst.msk [vmem:[#allocation3 + $0x28] sm:$0xff] %vm360_vm2, %v675_v61 }
0x1589   :  { %1147 = vst.msk [vmem:[#allocation3 + $0x28] sm:$0xff] %vm184_vm1, %v2342_v40  ;;  %v1469_v40 = vld [vmem:[#allocation3 + $0x8] sm:$0xff] }
0x158b   :  { %v358_v36 = vpop.permute.xlu1 %357  ;;  %v1471_v7 = vld [vmem:[#allocation3 + $0x18] sm:$0xff] }
0x158c   :  { %1455 = vrot.lane.b32.xlu0 %v1449_v62, %s2024_s3  ;;  %361 = vst.msk [vmem:[#allocation3 + $0x38] sm:$0xff] %vm360_vm2, %v358_v36 }
0x1590   :  { %v1473_v10 = vld [vmem:[#allocation3 + $0x28] sm:$0xff] }
0x15ee   :  { %v1465_v63 = vpop.permute.xlu0 %1464  ;;  %v1458_v11 = vpop.permute.xlu1 %1457 }
0x15ef   :  { %1467 = vst.msk [vmem:[#allocation3] sm:$0xff] %vm360_vm2, %v1465_v63 }
0x15f0   :  { %1462 = vst.msk [vmem:[#allocation4 + $0x8] sm:$0xff] %vm184_vm1, %v1458_v11 }
0x15f2   :  { %v1149_v0 = vpop.permute.xlu0 %1148 }
0x15f3   :  { %1151 = vst.msk [vmem:[#allocation3 + $0x10] sm:$0xff] %vm360_vm2, %v1149_v0 }
0x15f6   :  { %v833_v49 = vpop.permute.xlu0 %832  ;;  %v1468_v1 = vld [vmem:[#allocation3] sm:$0xff] }
0x15f7   :  { %835 = vst.msk [vmem:[#allocation3 + $0x20] sm:$0xff] %vm360_vm2, %v833_v49  ;;  %1880 = vmatprep.mubr.msk.f32.mxu0 %vm1491_vm3, %v1468_v1 }
0x15f8   :  { %989 = vst.msk [vmem:[#allocation3 + $0x20] sm:$0xff] %vm184_vm1, %v2313_v60  ;;  %1881 = vmatmul.mubr.msk.f32.vlgmr.msra.gmra.mxu0 %vm1491_vm3, %v1469_v40 }
0x15fa   :  { %v517_v2 = vpop.permute.xlu0 %516  ;;  %v1470_v4 = vld [vmem:[#allocation3 + $0x10] sm:$0xff] }
0x15fb   :  { %519 = vst.msk [vmem:[#allocation3 + $0x30] sm:$0xff] %vm360_vm2, %v517_v2  ;;  %1883 = vmatprep.mubr.msk.f32.mxu0 %vm1491_vm3, %v1470_v4 }
0x15fc   :  { %1305 = vst.msk [vmem:[#allocation3 + $0x30] sm:$0xff] %vm184_vm1, %v2361_v13  ;;  %1884 = vmatmul.mubr.msk.f32.gmra.mxu0 %vm1491_vm3, %v1471_v7 }
0x15fe   :  { %v1456_v5 = vpop.permute.xlu0 %1455 }
0x15ff   :  { %1461 = vst.msk [vmem:[#allocation4] sm:$0xff] %vm184_vm1, %v1456_v5  ;;  %1463 = vst.msk [vmem:[#allocation3 + $0x38] sm:$0xff] %vm184_vm1, %v1456_v5  ;;  %v1472_v60 = vld [vmem:[#allocation3 + $0x20] sm:$0xff] }
0x1600   :  { %1886 = vmatprep.mubr.msk.f32.mxu0 %vm1491_vm3, %v1472_v60 }
0x1601   :  { %1887 = vmatmul.mubr.msk.f32.gmra.mxu0 %vm1491_vm3, %v1473_v10 }
0x1603   :  { %v1474_v6 = vld [vmem:[#allocation3 + $0x30] sm:$0xff] }
0x1604   :  { %1889 = vmatprep.mubr.msk.f32.mxu0 %vm1491_vm3, %v1474_v6 }
0x1606   :  { %v1475_v12 = vld [vmem:[#allocation3 + $0x38] sm:$0xff] }
0x1607   :  { %1890 = vmatmul.mubr.msk.f32.gmra.mxu0 %vm1491_vm3, %v1475_v12 }
0x16b8   :  { %v1882_v9 = vpop.f32.mrf.mxu0 }
0x16b9   :  { %v1588_v26 = vadd.f32 %v1882_v9, %v1677_v8 }
0x16ba   :  { %v1582_v13 = vpop.f32.mrf.mxu0 }
0x16bb   :  { %1623 = vst.msk [vmem:[%s2490_s8 + $0x8] sm:$0xff] %vm1621_vm4, %v1588_v26  ;;  %v1583_v28 = vadd.f32 %v1677_v8, %v1582_v13 }
0x16bc   :  { %v1885_v14 = vpop.f32.mrf.mxu0 }
0x16bd   :  { %1622 = vst.msk [vmem:[%s2490_s8] sm:$0xff] %vm1621_vm4, %v1583_v28  ;;  %v1598_v15 = vadd.f32 %v1885_v14, %v1677_v8 }
0x16be   :  { %v1592_v16 = vpop.f32.mrf.mxu0 }
0x16bf   :  { %1625 = vst.msk [vmem:[%s2490_s8 + $0x18] sm:$0xff] %vm1621_vm4, %v1598_v15  ;;  %v1593_v17 = vadd.f32 %v1677_v8, %v1592_v16 }
0x16c1   :  { %1624 = vst.msk [vmem:[%s2490_s8 + $0x10] sm:$0xff] %vm1621_vm4, %v1593_v17  ;;  %v1888_v18 = vpop.f32.mrf.mxu0 }
0x16c2   :  { %v1608_v19 = vadd.f32 %v1888_v18, %v1677_v8 }
0x16c3   :  { %v1602_v20 = vpop.f32.mrf.mxu0 }
0x16c4   :  { %1627 = vst.msk [vmem:[%s2490_s8 + $0x28] sm:$0xff] %vm1621_vm4, %v1608_v19  ;;  %v1603_v22 = vadd.f32 %v1677_v8, %v1602_v20 }
0x16c6   :  { %1626 = vst.msk [vmem:[%s2490_s8 + $0x20] sm:$0xff] %vm1621_vm4, %v1603_v22 }
0x16c7   :  { %v1891_v23 = vpop.f32.mrf.mxu0 }
0x16c8   :  { %v1618_v25 = vadd.f32 %v1891_v23, %v1677_v8 }
0x16c9   :  { %v1612_v27 = vpop.f32.mrf.mxu0 }
0x16ca   :  { %1629 = vst.msk [vmem:[%s2490_s8 + $0x38] sm:$0xff] %vm1621_vm4, %v1618_v25  ;;  %v1613_v29 = vadd.f32 %v1677_v8, %v1612_v27 }
0x16cc   :  { %1628 = vst.msk [vmem:[%s2490_s8 + $0x30] sm:$0xff] %vm1621_vm4, %v1613_v29 }

</bundles_post_ra>
